<compile_context>
chip_gen: v7x
topology: tpu7x:2x2x1
jax: 0.10.0
libtpu: 0.0.40
codegen_flags: <defaults>
</compile_context>

<pallas_src>
import functools

import jax
import jax.numpy as jnp
from jax.experimental import pallas as pl
from jax.experimental.pallas import tpu as pltpu


def _round_up(x, m):
    return ((x + m - 1) // m) * m


# ----------------------------- Pallas kernel -------------------------------

def _conv_bias_relu_kernel(x_ref, w_ref, b_ref, o_ref, acc_ref, *,
                           kh, kw, wp, h_out, w_out, stride):
    """Direct conv tile: kh*kw shifted matmul-accumulates + bias + ReLU.

    x_ref:   (1, tci, L)          flattened zero-padded activation (bf16)
    w_ref:   (kh*kw, tco, tci)    per-tap weight slices (bf16)
    b_ref:   (tco, 1)             bias (f32)
    o_ref:   (1, tco, H_out, W_out)  NCHW output tile
    acc_ref: (tco, H_out*Wp)      f32 accumulator (Wp = padded width)
    """
    ci = pl.program_id(2)

    @pl.when(ci == 0)
    def _init():
        acc_ref[...] = jnp.zeros_like(acc_ref)

    mrow = h_out * wp
    acc = acc_ref[...]
    # kh*kw shifted matmul-accumulates.  For tap (i, j) the operand is the
    # contiguous (strided for stride>1) lane slice starting at i*Wp + j of the
    # flattened padded image: column p = ho*Wp + wo holds x_pad[ho*s+i, wo*s+j].
    # Columns with wo >= W_out are junk (row wrap-around) and are dropped at
    # finalize; they never contaminate valid columns.
    for t in range(kh * kw):
        i, j = divmod(t, kw)
        off = i * wp + j
        sl = pl.ds(off, mrow) if stride == 1 else pl.ds(off, mrow, stride)
        x_tap = x_ref[0, :, sl]                       # (tci, mrow) bf16
        w_tap = w_ref[t]                              # (tco, tci)  bf16
        acc += jnp.dot(w_tap, x_tap, preferred_element_type=jnp.float32)
    acc_ref[...] = acc

    @pl.when(ci == pl.num_programs(2) - 1)
    def _finalize():
        # Bias added in f32 (review correctness note), then ReLU.
        res = jnp.maximum(acc_ref[...] + b_ref[...], 0.0).astype(o_ref.dtype)
        # Drop the (Wp - W_out) junk columns of each output row and store
        # straight into the NCHW output block (no host-side reshape/transpose).
        for ho in range(h_out):
            o_ref[0, :, ho, :] = res[:, ho * wp: ho * wp + w_out]


# ------------------------------ wrapper -------------------------------------

def standard_block_forward(x_nchw, weight, bias, *, stride=1, padding=1,
                           compute_dtype=jnp.bfloat16, out_dtype=jnp.float32):
    """StandardBlock('conv_2d', norm_type=None, activation='relu', dropout=0.0).

    x_nchw: (N, C_in, H, W) f32 ; weight: (C_out, C_in, KH, KW) f32 ; bias: (C_out,)
    returns (N, C_out, H_out, W_out) in `out_dtype` (use bf16 if the consumer is bf16).
    """
    n, c_in, h, w = x_nchw.shape
    c_out, _, kh, kw = weight.shape
    if stride < 1:
        raise ValueError("stride must be >= 1")
    # TODO(synk): padding_mode != 'zeros' (reflect/replicate) not implemented.

    h_out = (h + 2 * padding - kh) // stride + 1
    w_out = (w + 2 * padding - kw) // stride + 1
    hp, wp = h + 2 * padding, w + 2 * padding
    mrow = h_out * wp                                     # compute columns per image

    # ---- channel tiling (contraction = C_in tiles, parallel = C_out tiles) ----
    tci = c_in if c_in <= 256 else 256
    c_in_p = _round_up(c_in, tci)
    c_out_p = _round_up(c_out, 8)
    tco = c_out_p if c_out_p <= 256 else 256
    c_out_p = _round_up(c_out_p, tco)

    # ---- flat padded activation (single small pad; no im2col, no concatenates) ----
    max_off = (kh - 1) * wp + (kw - 1)
    l_needed = max_off + stride * (mrow - 1) + 1          # last flat index touched + 1
    extra_rows = max(0, -(-(l_needed - hp * wp) // wp))   # ceil-div, >= 0
    hp_ext = hp + extra_rows
    l_flat = hp_ext * wp

    xq = x_nchw.astype(compute_dtype)
    xpad = jnp.pad(xq, ((0, 0), (0, c_in_p - c_in),
                        (padding, padding + extra_rows), (padding, padding)))
    xflat = xpad.reshape(n, c_in_p, l_flat)               # free reshape (contiguous)

    # tap-major weight: (KH*KW, C_out_p, C_in_p), tiny tensor
    wq = jnp.transpose(weight.astype(compute_dtype), (2, 3, 0, 1)).reshape(kh * kw, c_out, c_in)
    wq = jnp.pad(wq, ((0, 0), (0, c_out_p - c_out), (0, c_in_p - c_in)))
    b2 = jnp.pad(bias.astype(jnp.float32), (0, c_out_p - c_out)).reshape(c_out_p, 1)

    grid = (n, c_out_p // tco, c_in_p // tci)             # (parallel, parallel, arbitrary)

    kernel = functools.partial(_conv_bias_relu_kernel, kh=kh, kw=kw, wp=wp,
                               h_out=h_out, w_out=w_out, stride=stride)

    # VMEM budget (double-buffered inputs/outputs + accumulator), with headroom;
    # v5e scoped default is 16 MiB, v7x physical VMEM is 64 MiB -> cap at 64 MiB.
    out_bytes = jnp.dtype(out_dtype).itemsize
    est = (2 * _round_up(tci, 16) * _round_up(l_flat, 128) * 2
           + 2 * kh * kw * _round_up(tco, 8) * _round_up(tci, 128) * 2
           + 2 * _round_up(tco, 8) * 128 * 4
           + 2 * tco * _round_up(h_out, 8) * _round_up(w_out, 128) * out_bytes
           + _round_up(tco, 8) * _round_up(mrow, 128) * 4)
    vmem_limit = int(min(64 * 2 ** 20, max(16 * 2 ** 20, 2 * est)))

    out = pl.pallas_call(
        kernel,
        out_shape=jax.ShapeDtypeStruct((n, c_out_p, h_out, w_out), out_dtype),
        grid_spec=pltpu.PrefetchScalarGridSpec(
            num_scalar_prefetch=0,
            grid=grid,
            in_specs=[
                # activation: one C_in tile of one image, full flattened spatial
                pl.BlockSpec((1, tci, l_flat), lambda b, co, ci: (b, ci, 0)),
                # weights: all taps for this (C_out tile, C_in tile)
                pl.BlockSpec((kh * kw, tco, tci), lambda b, co, ci: (0, co, ci)),
                # bias: this C_out tile (f32)
                pl.BlockSpec((tco, 1), lambda b, co, ci: (co, 0)),
            ],
            out_specs=pl.BlockSpec((1, tco, h_out, w_out),
                                   lambda b, co, ci: (b, co, 0, 0)),
            scratch_shapes=[pltpu.VMEM((tco, mrow), jnp.float32)],
        ),
        compiler_params=pltpu.CompilerParams(
            dimension_semantics=("parallel", "parallel", "arbitrary"),
            vmem_limit_bytes=vmem_limit,
        ),
    )(xflat, wq, b2)

    if c_out_p != c_out:
        out = out[:, :c_out]
    # Dropout2d(p=0.0) is identity and norm_type=None -> nothing else to do.
    return out


# ------------------------------ reference -----------------------------------

def _reference(x, w, b, stride, padding):
    y = jax.lax.conv_general_dilated(
        x, w, window_strides=(stride, stride),
        padding=[(padding, padding), (padding, padding)],
        dimension_numbers=("NCHW", "OIHW", "NCHW"),
        precision=jax.lax.Precision.HIGHEST)
    return jnp.maximum(y + b.reshape(1, -1, 1, 1), 0.0)


# --------------------------------- main --------------------------------------

if __name__ == "__main__":
    # StandardBlock('conv_2d', nf_in=4, nf_out=8, kernel_size=3, stride=1,
    #               padding=1, norm_type=None, activation_type='relu',
    #               dropout_ratio=0.0, bias=True)
    N, C_in, H, W = 2, 4, 16, 16
    C_out, KH, KW = 8, 3, 3
    stride, padding = 1, 1

    key = jax.random.PRNGKey(0)
    kx, kw_, kb = jax.random.split(key, 3)

    x = jax.random.normal(kx, (N, C_in, H, W), dtype=jnp.float32)
    fan_in = C_in * KH * KW
    weight = jax.random.normal(kw_, (C_out, C_in, KH, KW), dtype=jnp.float32) * (fan_in ** -0.5)
    bias = jax.random.normal(kb, (C_out,), dtype=jnp.float32) * 0.1

    fwd = jax.jit(functools.partial(standard_block_forward, stride=stride, padding=padding))
    out = jax.block_until_ready(fwd(x, weight, bias))

    # Tight check: reference conv fed the same bf16-rounded activations/weights
    # (bf16*bf16 MXU products are exact, accumulation + bias add are f32 in both).
    xb = x.astype(jnp.bfloat16).astype(jnp.float32)
    wb = weight.astype(jnp.bfloat16).astype(jnp.float32)
    ref_bf16_inputs = _reference(xb, wb, bias, stride, padding)
    assert out.shape == ref_bf16_inputs.shape, (out.shape, ref_bf16_inputs.shape)
    assert jnp.allclose(out, ref_bf16_inputs, atol=1e-3, rtol=1e-3), \
        float(jnp.max(jnp.abs(out - ref_bf16_inputs)))

    # Loose sanity check vs. the full-f32 conv reference (only operand rounding
    # to bf16 differs; fan_in=36 keeps the error small).
    ref_f32 = _reference(x, weight, bias, stride, padding)
    assert jnp.allclose(out, ref_f32, atol=3e-2, rtol=3e-2), \
        float(jnp.max(jnp.abs(out - ref_f32)))

    print("KERNEL_OK")
</pallas_src>

<mosaic_0001>
module attributes {stable_mosaic.version = 11 : i64} {
  func.func @_conv_bias_relu_kernel(%arg0: i32, %arg1: i32, %arg2: i32, %arg3: memref<1x4x342xbf16, #tpu.memory_space<vmem>>, %arg4: memref<9x8x4xbf16, #tpu.memory_space<vmem>>, %arg5: memref<8x1xf32, #tpu.memory_space<vmem>>, %arg6: memref<1x8x16x16xf32, #tpu.memory_space<vmem>>, %arg7: memref<8x288xf32, #tpu.memory_space<vmem>>) attributes {dimension_semantics = [#tpu.dimension_semantics<parallel>, #tpu.dimension_semantics<parallel>, #tpu.dimension_semantics<arbitrary>], iteration_bounds = array<i64: 2, 1, 1>, scalar_prefetch = 0 : i64, scratch_operands = 1 : i64, tpu.core_type = #tpu.core_type<tc>, window_params = [{transform_indices = @transform_0, window_bounds = array<i64: 1, 4, 342>}, {transform_indices = @transform_1, window_bounds = array<i64: 9, 8, 4>}, {transform_indices = @transform_2, window_bounds = array<i64: 8, 1>}, {transform_indices = @transform_3, window_bounds = array<i64: 1, 8, 16, 16>}]} {
    %c0_i32 = arith.constant 0 : i32
    %0 = arith.cmpi eq, %arg2, %c0_i32 : i32
    %1 = arith.extui %0 : i1 to i32
    %c0_i32_0 = arith.constant 0 : i32
    %2 = arith.cmpi ne, %1, %c0_i32_0 : i32
    scf.if %2 {
      %cst_54 = arith.constant 0.000000e+00 : f32
      %62 = vector.broadcast %cst_54 : f32 to vector<8x288xf32>
      %c0_55 = arith.constant 0 : index
      %c0_56 = arith.constant 0 : index
      %63 = vector.load %arg7[%c0_55, %c0_56] : memref<8x288xf32, #tpu.memory_space<vmem>>, vector<8x288xf32>
      tpu.vector_store %arg7[%c0_55, %c0_56], %62 {strides = array<i32>} : memref<8x288xf32, #tpu.memory_space<vmem>>, vector<8x288xf32>,
    } else {
    }
    %c0 = arith.constant 0 : index
    %c0_1 = arith.constant 0 : index
    %3 = vector.load %arg7[%c0, %c0_1] : memref<8x288xf32, #tpu.memory_space<vmem>>, vector<8x288xf32>
    %c0_2 = arith.constant 0 : index
    %c0_3 = arith.constant 0 : index
    %c0_4 = arith.constant 0 : index
    %4 = vector.load %arg3[%c0_2, %c0_3, %c0_4] : memref<1x4x342xbf16, #tpu.memory_space<vmem>>, vector<1x4x288xbf16>
    %5 = vector.shape_cast %4 : vector<1x4x288xbf16> to vector<4x288xbf16>
    %c0_5 = arith.constant 0 : index
    %c0_6 = arith.constant 0 : index
    %c0_7 = arith.constant 0 : index
    %6 = vector.load %arg4[%c0_5, %c0_6, %c0_7] : memref<9x8x4xbf16, #tpu.memory_space<vmem>>, vector<1x8x4xbf16>
    %7 = vector.shape_cast %6 : vector<1x8x4xbf16> to vector<8x4xbf16>
    %cst = arith.constant dense<0.000000e+00> : vector<8x288xf32>
    %8 = tpu.matmul %7, %5, %cst {dimension_numbers = #tpu.dot_dimension_numbers<[1], [0], [0], [1], [0, 0, 1, 1], [], []>} : vector<8x4xbf16>, vector<4x288xbf16>, vector<8x288xf32> -> vector<8x288xf32>
    %9 = arith.addf %3, %8 : vector<8x288xf32>
    %c0_8 = arith.constant 0 : index
    %c0_9 = arith.constant 0 : index
    %c1 = arith.constant 1 : index
    %10 = vector.load %arg3[%c0_8, %c0_9, %c1] : memref<1x4x342xbf16, #tpu.memory_space<vmem>>, vector<1x4x288xbf16>
    %11 = vector.shape_cast %10 : vector<1x4x288xbf16> to vector<4x288xbf16>
    %c1_10 = arith.constant 1 : index
    %c0_11 = arith.constant 0 : index
    %c0_12 = arith.constant 0 : index
    %12 = vector.load %arg4[%c1_10, %c0_11, %c0_12] : memref<9x8x4xbf16, #tpu.memory_space<vmem>>, vector<1x8x4xbf16>
    %13 = vector.shape_cast %12 : vector<1x8x4xbf16> to vector<8x4xbf16>
    %cst_13 = arith.constant dense<0.000000e+00> : vector<8x288xf32>
    %14 = tpu.matmul %13, %11, %cst_13 {dimension_numbers = #tpu.dot_dimension_numbers<[1], [0], [0], [1], [0, 0, 1, 1], [], []>} : vector<8x4xbf16>, vector<4x288xbf16>, vector<8x288xf32> -> vector<8x288xf32>
    %15 = arith.addf %9, %14 : vector<8x288xf32>
    %c0_14 = arith.constant 0 : index
    %c0_15 = arith.constant 0 : index
    %c2 = arith.constant 2 : index
    %16 = vector.load %arg3[%c0_14, %c0_15, %c2] : memref<1x4x342xbf16, #tpu.memory_space<vmem>>, vector<1x4x288xbf16>
    %17 = vector.shape_cast %16 : vector<1x4x288xbf16> to vector<4x288xbf16>
    %c2_16 = arith.constant 2 : index
    %c0_17 = arith.constant 0 : index
    %c0_18 = arith.constant 0 : index
    %18 = vector.load %arg4[%c2_16, %c0_17, %c0_18] : memref<9x8x4xbf16, #tpu.memory_space<vmem>>, vector<1x8x4xbf16>
    %19 = vector.shape_cast %18 : vector<1x8x4xbf16> to vector<8x4xbf16>
    %cst_19 = arith.constant dense<0.000000e+00> : vector<8x288xf32>
    %20 = tpu.matmul %19, %17, %cst_19 {dimension_numbers = #tpu.dot_dimension_numbers<[1], [0], [0], [1], [0, 0, 1, 1], [], []>} : vector<8x4xbf16>, vector<4x288xbf16>, vector<8x288xf32> -> vector<8x288xf32>
    %21 = arith.addf %15, %20 : vector<8x288xf32>
    %c0_20 = arith.constant 0 : index
    %c0_21 = arith.constant 0 : index
    %c18 = arith.constant 18 : index
    %22 = vector.load %arg3[%c0_20, %c0_21, %c18] : memref<1x4x342xbf16, #tpu.memory_space<vmem>>, vector<1x4x288xbf16>
    %23 = vector.shape_cast %22 : vector<1x4x288xbf16> to vector<4x288xbf16>
    %c3 = arith.constant 3 : index
    %c0_22 = arith.constant 0 : index
    %c0_23 = arith.constant 0 : index
    %24 = vector.load %arg4[%c3, %c0_22, %c0_23] : memref<9x8x4xbf16, #tpu.memory_space<vmem>>, vector<1x8x4xbf16>
    %25 = vector.shape_cast %24 : vector<1x8x4xbf16> to vector<8x4xbf16>
    %cst_24 = arith.constant dense<0.000000e+00> : vector<8x288xf32>
    %26 = tpu.matmul %25, %23, %cst_24 {dimension_numbers = #tpu.dot_dimension_numbers<[1], [0], [0], [1], [0, 0, 1, 1], [], []>} : vector<8x4xbf16>, vector<4x288xbf16>, vector<8x288xf32> -> vector<8x288xf32>
    %27 = arith.addf %21, %26 : vector<8x288xf32>
    %c0_25 = arith.constant 0 : index
    %c0_26 = arith.constant 0 : index
    %c19 = arith.constant 19 : index
    %28 = vector.load %arg3[%c0_25, %c0_26, %c19] : memref<1x4x342xbf16, #tpu.memory_space<vmem>>, vector<1x4x288xbf16>
    %29 = vector.shape_cast %28 : vector<1x4x288xbf16> to vector<4x288xbf16>
    %c4 = arith.constant 4 : index
    %c0_27 = arith.constant 0 : index
    %c0_28 = arith.constant 0 : index
    %30 = vector.load %arg4[%c4, %c0_27, %c0_28] : memref<9x8x4xbf16, #tpu.memory_space<vmem>>, vector<1x8x4xbf16>
    %31 = vector.shape_cast %30 : vector<1x8x4xbf16> to vector<8x4xbf16>
    %cst_29 = arith.constant dense<0.000000e+00> : vector<8x288xf32>
    %32 = tpu.matmul %31, %29, %cst_29 {dimension_numbers = #tpu.dot_dimension_numbers<[1], [0], [0], [1], [0, 0, 1, 1], [], []>} : vector<8x4xbf16>, vector<4x288xbf16>, vector<8x288xf32> -> vector<8x288xf32>
    %33 = arith.addf %27, %32 : vector<8x288xf32>
    %c0_30 = arith.constant 0 : index
    %c0_31 = arith.constant 0 : index
    %c20 = arith.constant 20 : index
    %34 = vector.load %arg3[%c0_30, %c0_31, %c20] : memref<1x4x342xbf16, #tpu.memory_space<vmem>>, vector<1x4x288xbf16>
    %35 = vector.shape_cast %34 : vector<1x4x288xbf16> to vector<4x288xbf16>
    %c5 = arith.constant 5 : index
    %c0_32 = arith.constant 0 : index
    %c0_33 = arith.constant 0 : index
    %36 = vector.load %arg4[%c5, %c0_32, %c0_33] : memref<9x8x4xbf16, #tpu.memory_space<vmem>>, vector<1x8x4xbf16>
    %37 = vector.shape_cast %36 : vector<1x8x4xbf16> to vector<8x4xbf16>
    %cst_34 = arith.constant dense<0.000000e+00> : vector<8x288xf32>
    %38 = tpu.matmul %37, %35, %cst_34 {dimension_numbers = #tpu.dot_dimension_numbers<[1], [0], [0], [1], [0, 0, 1, 1], [], []>} : vector<8x4xbf16>, vector<4x288xbf16>, vector<8x288xf32> -> vector<8x288xf32>
    %39 = arith.addf %33, %38 : vector<8x288xf32>
    %c0_35 = arith.constant 0 : index
    %c0_36 = arith.constant 0 : index
    %c36 = arith.constant 36 : index
    %40 = vector.load %arg3[%c0_35, %c0_36, %c36] : memref<1x4x342xbf16, #tpu.memory_space<vmem>>, vector<1x4x288xbf16>
    %41 = vector.shape_cast %40 : vector<1x4x288xbf16> to vector<4x288xbf16>
    %c6 = arith.constant 6 : index
    %c0_37 = arith.constant 0 : index
    %c0_38 = arith.constant 0 : index
    %42 = vector.load %arg4[%c6, %c0_37, %c0_38] : memref<9x8x4xbf16, #tpu.memory_space<vmem>>, vector<1x8x4xbf16>
    %43 = vector.shape_cast %42 : vector<1x8x4xbf16> to vector<8x4xbf16>
    %cst_39 = arith.constant dense<0.000000e+00> : vector<8x288xf32>
    %44 = tpu.matmul %43, %41, %cst_39 {dimension_numbers = #tpu.dot_dimension_numbers<[1], [0], [0], [1], [0, 0, 1, 1], [], []>} : vector<8x4xbf16>, vector<4x288xbf16>, vector<8x288xf32> -> vector<8x288xf32>
    %45 = arith.addf %39, %44 : vector<8x288xf32>
    %c0_40 = arith.constant 0 : index
    %c0_41 = arith.constant 0 : index
    %c37 = arith.constant 37 : index
    %46 = vector.load %arg3[%c0_40, %c0_41, %c37] : memref<1x4x342xbf16, #tpu.memory_space<vmem>>, vector<1x4x288xbf16>
    %47 = vector.shape_cast %46 : vector<1x4x288xbf16> to vector<4x288xbf16>
    %c7 = arith.constant 7 : index
    %c0_42 = arith.constant 0 : index
    %c0_43 = arith.constant 0 : index
    %48 = vector.load %arg4[%c7, %c0_42, %c0_43] : memref<9x8x4xbf16, #tpu.memory_space<vmem>>, vector<1x8x4xbf16>
    %49 = vector.shape_cast %48 : vector<1x8x4xbf16> to vector<8x4xbf16>
    %cst_44 = arith.constant dense<0.000000e+00> : vector<8x288xf32>
    %50 = tpu.matmul %49, %47, %cst_44 {dimension_numbers = #tpu.dot_dimension_numbers<[1], [0], [0], [1], [0, 0, 1, 1], [], []>} : vector<8x4xbf16>, vector<4x288xbf16>, vector<8x288xf32> -> vector<8x288xf32>
    %51 = arith.addf %45, %50 : vector<8x288xf32>
    %c0_45 = arith.constant 0 : index
    %c0_46 = arith.constant 0 : index
    %c38 = arith.constant 38 : index
    %52 = vector.load %arg3[%c0_45, %c0_46, %c38] : memref<1x4x342xbf16, #tpu.memory_space<vmem>>, vector<1x4x288xbf16>
    %53 = vector.shape_cast %52 : vector<1x4x288xbf16> to vector<4x288xbf16>
    %c8 = arith.constant 8 : index
    %c0_47 = arith.constant 0 : index
    %c0_48 = arith.constant 0 : index
    %54 = vector.load %arg4[%c8, %c0_47, %c0_48] : memref<9x8x4xbf16, #tpu.memory_space<vmem>>, vector<1x8x4xbf16>
    %55 = vector.shape_cast %54 : vector<1x8x4xbf16> to vector<8x4xbf16>
    %cst_49 = arith.constant dense<0.000000e+00> : vector<8x288xf32>
    %56 = tpu.matmul %55, %53, %cst_49 {dimension_numbers = #tpu.dot_dimension_numbers<[1], [0], [0], [1], [0, 0, 1, 1], [], []>} : vector<8x4xbf16>, vector<4x288xbf16>, vector<8x288xf32> -> vector<8x288xf32>
    %57 = arith.addf %51, %56 : vector<8x288xf32>
    %c0_50 = arith.constant 0 : index
    %c0_51 = arith.constant 0 : index
    %58 = vector.load %arg7[%c0_50, %c0_51] : memref<8x288xf32, #tpu.memory_space<vmem>>, vector<8x288xf32>
    tpu.vector_store %arg7[%c0_50, %c0_51], %57 {strides = array<i32>} : memref<8x288xf32, #tpu.memory_space<vmem>>, vector<8x288xf32>,
    %c0_i32_52 = arith.constant 0 : i32
    %59 = arith.cmpi eq, %arg2, %c0_i32_52 : i32
    %60 = arith.extui %59 : i1 to i32
    %c0_i32_53 = arith.constant 0 : i32
    %61 = arith.cmpi ne, %60, %c0_i32_53 : i32
    scf.if %61 {
      %c0_54 = arith.constant 0 : index
      %c0_55 = arith.constant 0 : index
      %62 = vector.load %arg7[%c0_54, %c0_55] : memref<8x288xf32, #tpu.memory_space<vmem>>, vector<8x288xf32>
      %c0_56 = arith.constant 0 : index
      %c0_57 = arith.constant 0 : index
      %63 = vector.load %arg5[%c0_56, %c0_57] : memref<8x1xf32, #tpu.memory_space<vmem>>, vector<8x1xf32>
      %64 = vector.broadcast %63 : vector<8x1xf32> to vector<8x288xf32>
      %65 = arith.addf %62, %64 : vector<8x288xf32>
      %cst_58 = arith.constant 0.000000e+00 : f32
      %66 = vector.broadcast %cst_58 : f32 to vector<8x288xf32>
      %67 = arith.maximumf %65, %66 : vector<8x288xf32>
      %68 = vector.extract_strided_slice %67 {offsets = [0, 0], sizes = [8, 16], strides = [1, 1]} : vector<8x288xf32> to vector<8x16xf32>
      %c0_59 = arith.constant 0 : index
      %c0_60 = arith.constant 0 : index
      %c0_61 = arith.constant 0 : index
      %c0_62 = arith.constant 0 : index
      %69 = vector.load %arg6[%c0_59, %c0_60, %c0_61, %c0_62] : memref<1x8x16x16xf32, #tpu.memory_space<vmem>>, vector<1x8x1x16xf32>
      %70 = vector.shape_cast %69 : vector<1x8x1x16xf32> to vector<8x16xf32>
      %71 = vector.shape_cast %68 : vector<8x16xf32> to vector<1x8x1x16xf32>
      tpu.vector_store %arg6[%c0_59, %c0_60, %c0_61, %c0_62], %71 {strides = array<i32>} : memref<1x8x16x16xf32, #tpu.memory_space<vmem>>, vector<1x8x1x16xf32>,
      %72 = vector.extract_strided_slice %67 {offsets = [0, 18], sizes = [8, 16], strides = [1, 1]} : vector<8x288xf32> to vector<8x16xf32>
      %c0_63 = arith.constant 0 : index
      %c0_64 = arith.constant 0 : index
      %c1_65 = arith.constant 1 : index
      %c0_66 = arith.constant 0 : index
      %73 = vector.load %arg6[%c0_63, %c0_64, %c1_65, %c0_66] : memref<1x8x16x16xf32, #tpu.memory_space<vmem>>, vector<1x8x1x16xf32>
      %74 = vector.shape_cast %73 : vector<1x8x1x16xf32> to vector<8x16xf32>
      %75 = vector.shape_cast %72 : vector<8x16xf32> to vector<1x8x1x16xf32>
      tpu.vector_store %arg6[%c0_63, %c0_64, %c1_65, %c0_66], %75 {strides = array<i32>} : memref<1x8x16x16xf32, #tpu.memory_space<vmem>>, vector<1x8x1x16xf32>,
      %76 = vector.extract_strided_slice %67 {offsets = [0, 36], sizes = [8, 16], strides = [1, 1]} : vector<8x288xf32> to vector<8x16xf32>
      %c0_67 = arith.constant 0 : index
      %c0_68 = arith.constant 0 : index
      %c2_69 = arith.constant 2 : index
      %c0_70 = arith.constant 0 : index
      %77 = vector.load %arg6[%c0_67, %c0_68, %c2_69, %c0_70] : memref<1x8x16x16xf32, #tpu.memory_space<vmem>>, vector<1x8x1x16xf32>
      %78 = vector.shape_cast %77 : vector<1x8x1x16xf32> to vector<8x16xf32>
      %79 = vector.shape_cast %76 : vector<8x16xf32> to vector<1x8x1x16xf32>
      tpu.vector_store %arg6[%c0_67, %c0_68, %c2_69, %c0_70], %79 {strides = array<i32>} : memref<1x8x16x16xf32, #tpu.memory_space<vmem>>, vector<1x8x1x16xf32>,
      %80 = vector.extract_strided_slice %67 {offsets = [0, 54], sizes = [8, 16], strides = [1, 1]} : vector<8x288xf32> to vector<8x16xf32>
      %c0_71 = arith.constant 0 : index
      %c0_72 = arith.constant 0 : index
      %c3_73 = arith.constant 3 : index
      %c0_74 = arith.constant 0 : index
      %81 = vector.load %arg6[%c0_71, %c0_72, %c3_73, %c0_74] : memref<1x8x16x16xf32, #tpu.memory_space<vmem>>, vector<1x8x1x16xf32>
      %82 = vector.shape_cast %81 : vector<1x8x1x16xf32> to vector<8x16xf32>
      %83 = vector.shape_cast %80 : vector<8x16xf32> to vector<1x8x1x16xf32>
      tpu.vector_store %arg6[%c0_71, %c0_72, %c3_73, %c0_74], %83 {strides = array<i32>} : memref<1x8x16x16xf32, #tpu.memory_space<vmem>>, vector<1x8x1x16xf32>,
      %84 = vector.extract_strided_slice %67 {offsets = [0, 72], sizes = [8, 16], strides = [1, 1]} : vector<8x288xf32> to vector<8x16xf32>
      %c0_75 = arith.constant 0 : index
      %c0_76 = arith.constant 0 : index
      %c4_77 = arith.constant 4 : index
      %c0_78 = arith.constant 0 : index
      %85 = vector.load %arg6[%c0_75, %c0_76, %c4_77, %c0_78] : memref<1x8x16x16xf32, #tpu.memory_space<vmem>>, vector<1x8x1x16xf32>
      %86 = vector.shape_cast %85 : vector<1x8x1x16xf32> to vector<8x16xf32>
      %87 = vector.shape_cast %84 : vector<8x16xf32> to vector<1x8x1x16xf32>
      tpu.vector_store %arg6[%c0_75, %c0_76, %c4_77, %c0_78], %87 {strides = array<i32>} : memref<1x8x16x16xf32, #tpu.memory_space<vmem>>, vector<1x8x1x16xf32>,
      %88 = vector.extract_strided_slice %67 {offsets = [0, 90], sizes = [8, 16], strides = [1, 1]} : vector<8x288xf32> to vector<8x16xf32>
      %c0_79 = arith.constant 0 : index
      %c0_80 = arith.constant 0 : index
      %c5_81 = arith.constant 5 : index
      %c0_82 = arith.constant 0 : index
      %89 = vector.load %arg6[%c0_79, %c0_80, %c5_81, %c0_82] : memref<1x8x16x16xf32, #tpu.memory_space<vmem>>, vector<1x8x1x16xf32>
      %90 = vector.shape_cast %89 : vector<1x8x1x16xf32> to vector<8x16xf32>
      %91 = vector.shape_cast %88 : vector<8x16xf32> to vector<1x8x1x16xf32>
      tpu.vector_store %arg6[%c0_79, %c0_80, %c5_81, %c0_82], %91 {strides = array<i32>} : memref<1x8x16x16xf32, #tpu.memory_space<vmem>>, vector<1x8x1x16xf32>,
      %92 = vector.extract_strided_slice %67 {offsets = [0, 108], sizes = [8, 16], strides = [1, 1]} : vector<8x288xf32> to vector<8x16xf32>
      %c0_83 = arith.constant 0 : index
      %c0_84 = arith.constant 0 : index
      %c6_85 = arith.constant 6 : index
      %c0_86 = arith.constant 0 : index
      %93 = vector.load %arg6[%c0_83, %c0_84, %c6_85, %c0_86] : memref<1x8x16x16xf32, #tpu.memory_space<vmem>>, vector<1x8x1x16xf32>
      %94 = vector.shape_cast %93 : vector<1x8x1x16xf32> to vector<8x16xf32>
      %95 = vector.shape_cast %92 : vector<8x16xf32> to vector<1x8x1x16xf32>
      tpu.vector_store %arg6[%c0_83, %c0_84, %c6_85, %c0_86], %95 {strides = array<i32>} : memref<1x8x16x16xf32, #tpu.memory_space<vmem>>, vector<1x8x1x16xf32>,
      %96 = vector.extract_strided_slice %67 {offsets = [0, 126], sizes = [8, 16], strides = [1, 1]} : vector<8x288xf32> to vector<8x16xf32>
      %c0_87 = arith.constant 0 : index
      %c0_88 = arith.constant 0 : index
      %c7_89 = arith.constant 7 : index
      %c0_90 = arith.constant 0 : index
      %97 = vector.load %arg6[%c0_87, %c0_88, %c7_89, %c0_90] : memref<1x8x16x16xf32, #tpu.memory_space<vmem>>, vector<1x8x1x16xf32>
      %98 = vector.shape_cast %97 : vector<1x8x1x16xf32> to vector<8x16xf32>
      %99 = vector.shape_cast %96 : vector<8x16xf32> to vector<1x8x1x16xf32>
      tpu.vector_store %arg6[%c0_87, %c0_88, %c7_89, %c0_90], %99 {strides = array<i32>} : memref<1x8x16x16xf32, #tpu.memory_space<vmem>>, vector<1x8x1x16xf32>,
      %100 = vector.extract_strided_slice %67 {offsets = [0, 144], sizes = [8, 16], strides = [1, 1]} : vector<8x288xf32> to vector<8x16xf32>
      %c0_91 = arith.constant 0 : index
      %c0_92 = arith.constant 0 : index
      %c8_93 = arith.constant 8 : index
      %c0_94 = arith.constant 0 : index
      %101 = vector.load %arg6[%c0_91, %c0_92, %c8_93, %c0_94] : memref<1x8x16x16xf32, #tpu.memory_space<vmem>>, vector<1x8x1x16xf32>
      %102 = vector.shape_cast %101 : vector<1x8x1x16xf32> to vector<8x16xf32>
      %103 = vector.shape_cast %100 : vector<8x16xf32> to vector<1x8x1x16xf32>
      tpu.vector_store %arg6[%c0_91, %c0_92, %c8_93, %c0_94], %103 {strides = array<i32>} : memref<1x8x16x16xf32, #tpu.memory_space<vmem>>, vector<1x8x1x16xf32>,
      %104 = vector.extract_strided_slice %67 {offsets = [0, 162], sizes = [8, 16], strides = [1, 1]} : vector<8x288xf32> to vector<8x16xf32>
      %c0_95 = arith.constant 0 : index
      %c0_96 = arith.constant 0 : index
      %c9 = arith.constant 9 : index
      %c0_97 = arith.constant 0 : index
      %105 = vector.load %arg6[%c0_95, %c0_96, %c9, %c0_97] : memref<1x8x16x16xf32, #tpu.memory_space<vmem>>, vector<1x8x1x16xf32>
      %106 = vector.shape_cast %105 : vector<1x8x1x16xf32> to vector<8x16xf32>
      %107 = vector.shape_cast %104 : vector<8x16xf32> to vector<1x8x1x16xf32>
      tpu.vector_store %arg6[%c0_95, %c0_96, %c9, %c0_97], %107 {strides = array<i32>} : memref<1x8x16x16xf32, #tpu.memory_space<vmem>>, vector<1x8x1x16xf32>,
      %108 = vector.extract_strided_slice %67 {offsets = [0, 180], sizes = [8, 16], strides = [1, 1]} : vector<8x288xf32> to vector<8x16xf32>
      %c0_98 = arith.constant 0 : index
      %c0_99 = arith.constant 0 : index
      %c10 = arith.constant 10 : index
      %c0_100 = arith.constant 0 : index
      %109 = vector.load %arg6[%c0_98, %c0_99, %c10, %c0_100] : memref<1x8x16x16xf32, #tpu.memory_space<vmem>>, vector<1x8x1x16xf32>
      %110 = vector.shape_cast %109 : vector<1x8x1x16xf32> to vector<8x16xf32>
      %111 = vector.shape_cast %108 : vector<8x16xf32> to vector<1x8x1x16xf32>
      tpu.vector_store %arg6[%c0_98, %c0_99, %c10, %c0_100], %111 {strides = array<i32>} : memref<1x8x16x16xf32, #tpu.memory_space<vmem>>, vector<1x8x1x16xf32>,
      %112 = vector.extract_strided_slice %67 {offsets = [0, 198], sizes = [8, 16], strides = [1, 1]} : vector<8x288xf32> to vector<8x16xf32>
      %c0_101 = arith.constant 0 : index
      %c0_102 = arith.constant 0 : index
      %c11 = arith.constant 11 : index
      %c0_103 = arith.constant 0 : index
      %113 = vector.load %arg6[%c0_101, %c0_102, %c11, %c0_103] : memref<1x8x16x16xf32, #tpu.memory_space<vmem>>, vector<1x8x1x16xf32>
      %114 = vector.shape_cast %113 : vector<1x8x1x16xf32> to vector<8x16xf32>
      %115 = vector.shape_cast %112 : vector<8x16xf32> to vector<1x8x1x16xf32>
      tpu.vector_store %arg6[%c0_101, %c0_102, %c11, %c0_103], %115 {strides = array<i32>} : memref<1x8x16x16xf32, #tpu.memory_space<vmem>>, vector<1x8x1x16xf32>,
      %116 = vector.extract_strided_slice %67 {offsets = [0, 216], sizes = [8, 16], strides = [1, 1]} : vector<8x288xf32> to vector<8x16xf32>
      %c0_104 = arith.constant 0 : index
      %c0_105 = arith.constant 0 : index
      %c12 = arith.constant 12 : index
      %c0_106 = arith.constant 0 : index
      %117 = vector.load %arg6[%c0_104, %c0_105, %c12, %c0_106] : memref<1x8x16x16xf32, #tpu.memory_space<vmem>>, vector<1x8x1x16xf32>
      %118 = vector.shape_cast %117 : vector<1x8x1x16xf32> to vector<8x16xf32>
      %119 = vector.shape_cast %116 : vector<8x16xf32> to vector<1x8x1x16xf32>
      tpu.vector_store %arg6[%c0_104, %c0_105, %c12, %c0_106], %119 {strides = array<i32>} : memref<1x8x16x16xf32, #tpu.memory_space<vmem>>, vector<1x8x1x16xf32>,
      %120 = vector.extract_strided_slice %67 {offsets = [0, 234], sizes = [8, 16], strides = [1, 1]} : vector<8x288xf32> to vector<8x16xf32>
      %c0_107 = arith.constant 0 : index
      %c0_108 = arith.constant 0 : index
      %c13 = arith.constant 13 : index
      %c0_109 = arith.constant 0 : index
      %121 = vector.load %arg6[%c0_107, %c0_108, %c13, %c0_109] : memref<1x8x16x16xf32, #tpu.memory_space<vmem>>, vector<1x8x1x16xf32>
      %122 = vector.shape_cast %121 : vector<1x8x1x16xf32> to vector<8x16xf32>
      %123 = vector.shape_cast %120 : vector<8x16xf32> to vector<1x8x1x16xf32>
      tpu.vector_store %arg6[%c0_107, %c0_108, %c13, %c0_109], %123 {strides = array<i32>} : memref<1x8x16x16xf32, #tpu.memory_space<vmem>>, vector<1x8x1x16xf32>,
      %124 = vector.extract_strided_slice %67 {offsets = [0, 252], sizes = [8, 16], strides = [1, 1]} : vector<8x288xf32> to vector<8x16xf32>
      %c0_110 = arith.constant 0 : index
      %c0_111 = arith.constant 0 : index
      %c14 = arith.constant 14 : index
      %c0_112 = arith.constant 0 : index
      %125 = vector.load %arg6[%c0_110, %c0_111, %c14, %c0_112] : memref<1x8x16x16xf32, #tpu.memory_space<vmem>>, vector<1x8x1x16xf32>
      %126 = vector.shape_cast %125 : vector<1x8x1x16xf32> to vector<8x16xf32>
      %127 = vector.shape_cast %124 : vector<8x16xf32> to vector<1x8x1x16xf32>
      tpu.vector_store %arg6[%c0_110, %c0_111, %c14, %c0_112], %127 {strides = array<i32>} : memref<1x8x16x16xf32, #tpu.memory_space<vmem>>, vector<1x8x1x16xf32>,
      %128 = vector.extract_strided_slice %67 {offsets = [0, 270], sizes = [8, 16], strides = [1, 1]} : vector<8x288xf32> to vector<8x16xf32>
      %c0_113 = arith.constant 0 : index
      %c0_114 = arith.constant 0 : index
      %c15 = arith.constant 15 : index
      %c0_115 = arith.constant 0 : index
      %129 = vector.load %arg6[%c0_113, %c0_114, %c15, %c0_115] : memref<1x8x16x16xf32, #tpu.memory_space<vmem>>, vector<1x8x1x16xf32>
      %130 = vector.shape_cast %129 : vector<1x8x1x16xf32> to vector<8x16xf32>
      %131 = vector.shape_cast %128 : vector<8x16xf32> to vector<1x8x1x16xf32>
      tpu.vector_store %arg6[%c0_113, %c0_114, %c15, %c0_115], %131 {strides = array<i32>} : memref<1x8x16x16xf32, #tpu.memory_space<vmem>>, vector<1x8x1x16xf32>,
    } else {
    }
    return
  }
  func.func @transform_0(%arg0: i32, %arg1: i32, %arg2: i32) -> (i32, i32, i32) {
    %c0_i32 = arith.constant 0 : i32
    %c0_i32_0 = arith.constant 0 : i32
    return %arg0, %arg2, %c0_i32 : i32, i32, i32
  }
  func.func @transform_1(%arg0: i32, %arg1: i32, %arg2: i32) -> (i32, i32, i32) {
    %c0_i32 = arith.constant 0 : i32
    %c0_i32_0 = arith.constant 0 : i32
    return %c0_i32, %arg1, %arg2 : i32, i32, i32
  }
  func.func @transform_2(%arg0: i32, %arg1: i32, %arg2: i32) -> (i32, i32) {
    %c0_i32 = arith.constant 0 : i32
    %c0_i32_0 = arith.constant 0 : i32
    return %arg1, %c0_i32 : i32, i32
  }
  func.func @transform_3(%arg0: i32, %arg1: i32, %arg2: i32) -> (i32, i32, i32, i32) {
    %c0_i32 = arith.constant 0 : i32
    %c0_i32_0 = arith.constant 0 : i32
    %c0_i32_1 = arith.constant 0 : i32
    return %arg0, %arg1, %c0_i32, %c0_i32_0 : i32, i32, i32, i32
  }
}

</mosaic_0001>

<bundles_post_ra>
// kernel: standard_block_forward.1
= control target key start
LH: loop header
LB: loop body
LE: loop exit
PB: predicated region body
PF: predicated region fallthrough
CT: control target
= control target key end

     0   :  { %8 = vsyncpa [#allocation4], 0  ;;  %s4108_s0 = inlined_call_operand.vmem [shape: bf16[2,4,342], index: 0, kind: input, shape index: {}]   ;;  %s4109_s1 = inlined_call_operand.vmem [shape: bf16[9,8,4], index: 1, kind: input, shape index: {}]   ;;  %s4110_s2 = inlined_call_operand.vmem [shape: f32[8,1], index: 2, kind: input, shape index: {}]   ;;  %s4111_s3 = inlined_call_operand.hbm [shape: f32[2,8,16,16], index: 3, kind: output, shape index: {}]  }
   0x1   :  { %10 = vsyncpa [#allocation4 + $0x1], 0  ;;  %s2968_s12 = smov 0   ;;  %s2970_s13 = smov 0  }
   0x2   :  { %s2972_s14 = smov 0   ;;  %s2974_s15 = smov 0  }
   0x3   :  { %s2976_s16 = smov 0   ;;  %s2978_s17 = smov 0  }
   0x4 LB: > { %s2556_s18 = sadd.s32 4294967295, %s2917_s17   ;;  %s2557_s19 = sadd.s32 4294967294, %s2917_s17   ;;  %s2917_s17 = sphi %s2978_s17, %s16_s17   ;;  %s2913_s16 = sphi %s2976_s16, %s4125_s16   ;;  %s2909_s15 = sphi %s2974_s15, %s4124_s15   ;;  %s2905_s14 = sphi %s2972_s14, %s4123_s14   ;;  %s2901_s13 = sphi %s2970_s13, %s4122_s13   ;;  %s2897_s12 = sphi %s2968_s12, %s4121_s12  }
   0x5   : > { %s35_s20 = sadd.s32 1, %s2913_s16  ;;  %s126_s21 = sadd.s32 1, %s2905_s14 }
   0x6   : > { %p37_p0 = scmp.ge.s32.totalorder %s35_s20, 2  ;;  %p136_p1 = scmp.ne.s32.totalorder %s2905_s14, %s2901_s13 }
   0x7   : > { %p137_p2 = scmp.eq.s32.totalorder %s2556_s18, 1  ;;  %p142_p3 = scmp.ne.s32.totalorder %s2901_s13, %s2897_s12 }
   0x8   : > { %s4127_s20 = smov (%p37_p0, %s35_s20), 0  ;;  %p143_p5 = scmp.eq.s32.totalorder %s2557_s19, 1 }
   0x9   : > { %p3008_p4 = por %p137_p2, %p136_p1  ;;  %s121_s23 = ssub.s32 %s2913_s16, %s4127_s20 }
   0xa   : > { %p2562_p6 = scmp.ge.s32.totalorder %s2917_s17, 1  ;;  %p124_p7 = scmp.eq.s32.totalorder %s121_s23, 0 }
   0xb   : > { %p3015_p8 = por %p143_p5, %p142_p3  ;;  %p190_p9 = scmp.lt.s32.totalorder %s2917_s17, 3 }
   0xc   : > { %s3021_s25 = scalar_select %p124_p7, %s2905_s14, %s126_s21  }
   0xd   : > { %p191_p10 = pnand %p2562_p6, %p190_p9 }
   0xe   : > { %p229_p11 = scmp.lt.s32.totalorder (!%p191_p10), %s2909_s15, 1  ;;  %v269_v0 = vlaneseq (!%p191_p10)  ;;  %v2919_v1 = vmov (!%p191_p10), 1983009808   ;;  %v2920_v4 = vmov (!%p191_p10), 0.0   ;;  %vm2921_vm0 = vmmov (!%p191_p10), 0   ;;  %s2923_s4 = smov (!%p191_p10), 127  }
   0xf   : > { %194 = sbr.rel (%p191_p10) target bundleno = 867 (0x363), region = 32  ;;  %v267_v2 = vunpack.c.l.s4 (!%p191_p10), %v2919_v1  ;;  %2624 = vmatprep.subr.bf16.mxu1 (!%p191_p10), %v2920_v4  ;;  %2626 = vmatprep.mubr.msk.bf16.mxu1 (!%p191_p10), %vm2921_vm0, %v2920_v4  ;;  %v2922_v6 = vmov (!%p191_p10), 0   ;;  %s2924_s5 = smov (!%p191_p10), 126   ;;  %vm285_vm1 = vcmask (!%p191_p10), 1041408   ;;  %v263_v30 = vld [vmem:[%s4109_s1] sm:$0xf] (!%p191_p10) }
  0x10   : > { %v3025_v3 = vshrl.u32 (!%p191_p10), %v269_v0, 7  ;;  %327 = vmatprep.mubr.bf16.mxu0 (!%p191_p10), %v2922_v6  ;;  %2829 = vset.pattern.permute.xlu0 (!%p191_p10), %v2922_v6  ;;  %vm281_vm2 = vcmask (!%p191_p10), 31744   ;;  %s2925_s8 = smov (!%p191_p10), 110   ;;  %s2926_s9 = smov (!%p191_p10), 109   ;;  %v1389_v56 = vld [vmem:[%s4110_s2] sm:$0xff] (!%p191_p10)  ;;  %vm257_vm3 = vcmask (!%p191_p10), 261120  }
  0x11   : > { %v268_v5 = vunpack.c.0.s8 (!%p191_p10), %v267_v2  ;;  %s2927_s10 = smov (!%p191_p10), 108   ;;  %s2928_s11 = smov (!%p191_p10), 92   ;;  %258 = vst.msk [vmem:[#allocation2 + $0x10] sm:$0xff] (!%p191_p10), %vm257_vm3, %v2920_v4  ;;  %vm405_vm4 = vcmask (!%p191_p10), 1039360   ;;  %v2568_v61 = vld [vmem:[%s4109_s1 + $0x4] sm:$0xf] (!%p191_p10) }
  0x12   : > { %s2929_s18 = smov (!%p191_p10), 91   ;;  %s2930_s19 = smov (!%p191_p10), 90   ;;  %vm530_vm5 = vcmask (!%p191_p10), 1031168   ;;  %vm655_vm6 = vcmask (!%p191_p10), 900096   ;;  %vm780_vm7 = vcmask (!%p191_p10), 891904   ;;  %vm905_vm8 = vcmask (!%p191_p10), 883712  }
  0x13   : > { %v3033_v7 = vsub.s32 (!%p191_p10), %v268_v5, %v3025_v3  ;;  %vm1030_vm9 = vcmask (!%p191_p10), 752640   ;;  %vm1155_vm10 = vcmask (!%p191_p10), 744448   ;;  %vm1280_vm11 = vcmask (!%p191_p10), 736256   ;;  %s2935_s6 = smov (!%p191_p10), 38   ;;  %s2936_s7 = smov (!%p191_p10), 20  }
  0x14   : > { %vm1459_vm12 = vcmask (!%p191_p10), 122880   ;;  %s2941_s21 = smov (!%p191_p10), 58   ;;  %s2942_s23 = smov (!%p191_p10), 40   ;;  %vm1839_vm13 = vcmask (!%p191_p10), 15360  }
  0x16   : > { %s230_s26 = scalar_select %p229_p11, %s2909_s15, 1 }
  0x18   : > { %s2745_s27 = smul.u32 6, %s230_s26  ;;  %s2943_s26 = smov 22  }
  0x1a   : > { %s3038_s30 = scalar_lea.vmem %s4108_s0, %s2745_s27  ;;  %s226_s27 = sand.u32 1, %s2901_s13  }
  0x1b   : > { %v379_v8 = vld [vmem:[%s3038_s30] sm:$0x3f]  ;;  %s2563_s28 = sshll.u32 %s226_s27, 7 }
  0x1c   : > { %v390_v9 = vrot.slane %v379_v8, %v3033_v7  ;;  %v383_v10 = vcombine.high %v379_v8, %v379_v8  ;;  %v504_v11 = vld [vmem:[%s3038_s30] sm:$0x3f]  ;;  %s3203_s29 = scalar_lea.vmem [#allocation3], %s2563_s28  ;;  %s2944_s28 = smov 4  }
  0x1d   : > { %v515_v14 = vrot.slane %v504_v11, %v3033_v7  ;;  %v508_v15 = vcombine.high %v504_v11, %v504_v11  ;;  %v262_v16 = vld [vmem:[%s3038_s30] sm:$0x3f] }
  0x1e   : > { %399 = vrot.lane.b32.xlu0 %v390_v9, %s2923_s4  ;;  %v398_v12 = vcombine.high %v390_v9, %v390_v9  ;;  %v397_v13 = vrot.slane %v383_v10, %v3033_v7  ;;  %v629_v18 = vld [vmem:[%s3038_s30] sm:$0x3f]  ;;  %v265_v20 = vcombine.high %v262_v16, %v262_v16  ;;  %v272_v21 = vrot.slane %v262_v16, %v3033_v7 }
  0x1f   : > { %v523_v17 = vcombine.high %v515_v14, %v515_v14  ;;  %v522_v19 = vrot.slane %v508_v15, %v3033_v7  ;;  %v640_v22 = vrot.slane %v629_v18, %v3033_v7  ;;  %v633_v23 = vcombine.high %v629_v18, %v629_v18  ;;  %v754_v29 = vld [vmem:[%s3038_s30] sm:$0x3f] }
  0x20   : > { %403 = vrot.lane.b32.xlu1 %v397_v13, %s2923_s4  ;;  %v279_v24 = vrot.slane %v265_v20, %v3033_v7  ;;  %v280_v25 = vcombine.high %v272_v21, %v272_v21  ;;  %v287_v26 = vsel %vm285_vm1, %v272_v21, 0  ;;  %v765_v32 = vrot.slane %v754_v29, %v3033_v7  ;;  %v879_v35 = vld [vmem:[%s3038_s30] sm:$0x3f]  ;;  %v2572_v13 = vld [vmem:[%s4109_s1 + $0x8] sm:$0xf] }
  0x21   : > { %v648_v27 = vcombine.high %v640_v22, %v640_v22  ;;  %v647_v31 = vrot.slane %v633_v23, %v3033_v7  ;;  %v758_v33 = vcombine.high %v754_v29, %v754_v29  ;;  %v890_v37 = vrot.slane %v879_v35, %v3033_v7  ;;  %v1004_v40 = vld [vmem:[%s3038_s30] sm:$0x3f] }
  0x22   : > { %401 = vrot.lane.b32.xlu0 %v398_v12, %s2923_s4  ;;  %v293_v28 = vsel %vm285_vm1, %v279_v24, 0  ;;  %2565 = vmatprep.subr.msk.bf16.mxu0 %vm285_vm1, %v280_v25  ;;  %v773_v34 = vcombine.high %v765_v32, %v765_v32  ;;  %v883_v38 = vcombine.high %v879_v35, %v879_v35  ;;  %v1015_v42 = vrot.slane %v1004_v40, %v3033_v7  ;;  %v1129_v45 = vld [vmem:[%s3038_s30] sm:$0x3f]  ;;  %v2576_v24 = vld [vmem:[%s4109_s1 + $0xc] sm:$0xf]  ;;  %s2933_s4 = smov 74  }
  0x23   : > { %2625 = vmatpush3.bf16.msra.mxu1 %v293_v28  ;;  %296 = vmatpush1.bf16.msra.mxu0 %v287_v26  ;;  %v772_v36 = vrot.slane %v758_v33, %v3033_v7  ;;  %v898_v39 = vcombine.high %v890_v37, %v890_v37  ;;  %v1008_v43 = vcombine.high %v1004_v40, %v1004_v40  ;;  %v1254_v50 = vld [vmem:[%s3038_s30] sm:$0x3f]  ;;  %v2584_v40 = vld [vmem:[%s4109_s1 + $0x14] sm:$0xf]  ;;  %s2932_s30 = smov 114  }
  0x24   : > { %524 = vrot.lane.b32.xlu1 %v515_v14, %s2924_s5  ;;  %2630 = vmatprep.subr.bf16.mxu1 %v2920_v4  ;;  %v897_v41 = vrot.slane %v883_v38, %v3033_v7  ;;  %v1023_v44 = vcombine.high %v1015_v42, %v1015_v42  ;;  %v1140_v47 = vrot.slane %v1129_v45, %v3033_v7 }
  0x25   : > { %v1022_v46 = vrot.slane %v1008_v43, %v3033_v7  ;;  %v1133_v48 = vcombine.high %v1129_v45, %v1129_v45  ;;  %v1265_v52 = vrot.slane %v1254_v50, %v3033_v7  ;;  %v1258_v53 = vcombine.high %v1254_v50, %v1254_v50 }
  0x26   : > { %526 = vrot.lane.b32.xlu0 %v523_v17, %s2924_s5  ;;  %2627 = vmatmul.mubr.msk.bf16.vlgmr.msra.gmra.mrb[0].mxu1 %vm281_vm2, %v263_v30  ;;  %v1148_v49 = vcombine.high %v1140_v47, %v1140_v47 }
  0x27   : > { %2566 = vmatmul.mubr.msk.bf16.vlgmr.msra.gmra.mrb[0].mxu0 %vm281_vm2, %v263_v30  ;;  %2632 = vmatprep.mubr.msk.bf16.mxu1 %vm2921_vm0, %v2920_v4  ;;  %v1147_v51 = vrot.slane %v1133_v48, %v3033_v7  ;;  %v1273_v54 = vcombine.high %v1265_v52, %v1265_v52  ;;  %v1272_v55 = vrot.slane %v1258_v53, %v3033_v7  ;;  %v2588_v48 = vld [vmem:[%s4109_s1 + $0x18] sm:$0xf] }
  0x28   : > { %528 = vrot.lane.b32.xlu1 %v522_v19, %s2924_s5  ;;  %452 = vmatprep.mubr.bf16.mxu0 %v2922_v6  ;;  %s2934_s5 = smov 56  }
  0x2a   : > { %649 = vrot.lane.b32.xlu0 %v640_v22, %s2925_s8 }
  0x2c   : > { %651 = vrot.lane.b32.xlu1 %v648_v27, %s2925_s8 }
  0x2e   : > { %653 = vrot.lane.b32.xlu0 %v647_v31, %s2925_s8 }
  0x30   : > { %774 = vrot.lane.b32.xlu1 %v765_v32, %s2926_s9  ;;  %v2580_v32 = vld [vmem:[%s4109_s1 + $0x10] sm:$0xf] }
  0x32   : > { %776 = vrot.lane.b32.xlu0 %v773_v34, %s2926_s9 }
  0x34   : > { %778 = vrot.lane.b32.xlu1 %v772_v36, %s2926_s9  ;;  %s2937_s9 = smov 112  }
  0x36   : > { %899 = vrot.lane.b32.xlu0 %v890_v37, %s2927_s10 }
  0x38   : > { %901 = vrot.lane.b32.xlu1 %v898_v39, %s2927_s10 }
  0x3a   : > { %903 = vrot.lane.b32.xlu0 %v897_v41, %s2927_s10  ;;  %s2938_s10 = smov 94  }
  0x3c   : > { %1024 = vrot.lane.b32.xlu1 %v1015_v42, %s2928_s11 }
  0x3e   : > { %1026 = vrot.lane.b32.xlu0 %v1023_v44, %s2928_s11 }
  0x40   : > { %1028 = vrot.lane.b32.xlu1 %v1022_v46, %s2928_s11 }
  0x42   : > { %1149 = vrot.lane.b32.xlu0 %v1140_v47, %s2929_s18 }
  0x44   : > { %1151 = vrot.lane.b32.xlu1 %v1148_v49, %s2929_s18 }
  0x46   : > { %1153 = vrot.lane.b32.xlu0 %v1147_v51, %s2929_s18  ;;  %s2939_s18 = smov 2  }
  0x48   : > { %1274 = vrot.lane.b32.xlu1 %v1265_v52, %s2930_s19 }
  0x4a   : > { %1276 = vrot.lane.b32.xlu0 %v1273_v54, %s2930_s19 }
  0x4c   : > { %1278 = vrot.lane.b32.xlu1 %v1272_v55, %s2930_s19  ;;  %v2592_v55 = vld [vmem:[%s4109_s1 + $0x1c] sm:$0xf]  ;;  %s2940_s19 = smov 76  }
  0x4e   : > { %1392 = vperm.xlu0 %2829, %v1389_v56  }
  0x90   : > { %v400_v57 = vpop.permute.xlu0 %399 }
  0x92   : > { %v404_v58 = vpop.permute.xlu1 %403 }
  0x93   : > { %v418_v59 = vsel %vm285_vm1, %v404_v58, 0 }
  0x94   : > { %v402_v60 = vpop.permute.xlu0 %401  ;;  %2631 = vmatpush3.bf16.msra.mxu1 %v418_v59  ;;  %v2596_v59 = vld [vmem:[%s4109_s1 + $0x20] sm:$0xf] }
  0x95   : > { %v406_v62 = vsel %vm405_vm4, %v400_v57, %v402_v60  ;;  %v407_v63 = vsel %vm405_vm4, %v402_v60, %v404_v58  ;;  %2636 = vmatprep.subr.bf16.mxu1 %v2920_v4  ;;  %v2931_v60 = vmov 1966171168  }
  0x96   : > { %2569 = vmatprep.subr.msk.bf16.mxu0 %vm285_vm1, %v407_v63  ;;  %v412_v0 = vsel %vm285_vm1, %v406_v62, 0  ;;  %v525_v1 = vpop.permute.xlu1 %524  ;;  %v261_v62 = vld [vmem:[#allocation2 + $0x10] sm:$0xff] }
  0x97   : > { %421 = vmatpush1.bf16.msra.mxu0 %v412_v0  ;;  %2633 = vmatmul.mubr.msk.bf16.vlgmr.msra.gmra.mrb[0].mxu1 %vm281_vm2, %v2568_v61 }
  0x98   : > { %v527_v2 = vpop.permute.xlu0 %526  ;;  %2638 = vmatprep.mubr.msk.bf16.mxu1 %vm2921_vm0, %v2920_v4 }
  0x99   : > { %v531_v5 = vsel %vm530_vm5, %v525_v1, %v527_v2 }
  0x9a   : > { %2570 = vmatmul.mubr.msk.bf16.vlgmr.msra.gmra.mrb[0].mxu0 %vm281_vm2, %v2568_v61  ;;  %v529_v7 = vpop.permute.xlu1 %528  ;;  %v537_v8 = vsel %vm285_vm1, %v531_v5, 0  ;;  %v1404_v61 = vunpack.c.l.s4 %v2931_v60 }
  0x9b   : > { %v532_v9 = vsel %vm530_vm5, %v527_v2, %v529_v7  ;;  %v543_v10 = vsel %vm285_vm1, %v529_v7, 0  ;;  %577 = vmatprep.mubr.bf16.mxu0 %v2922_v6 }
  0x9c   : > { %2573 = vmatprep.subr.msk.bf16.mxu0 %vm285_vm1, %v532_v9  ;;  %2637 = vmatpush3.bf16.msra.mxu1 %v543_v10  ;;  %v650_v11 = vpop.permute.xlu0 %649  ;;  %v1405_v1 = vunpack.c.0.s8 %v1404_v61 }
  0x9d   : > { %546 = vmatpush1.bf16.msra.mxu0 %v537_v8  ;;  %2642 = vmatprep.subr.bf16.mxu1 %v2920_v4 }
  0x9e   : > { %v652_v12 = vpop.permute.xlu1 %651  ;;  %v3185_v10 = vsub.s32 %v1405_v1, %v3025_v3 }
  0x9f   : > { %v656_v15 = vsel %vm655_vm6, %v650_v11, %v652_v12 }
  0xa0   : > { %v654_v14 = vpop.permute.xlu0 %653  ;;  %v662_v19 = vsel %vm285_vm1, %v656_v15, 0 }
  0xa1   : > { %v657_v16 = vsel %vm655_vm6, %v652_v12, %v654_v14  ;;  %v668_v17 = vsel %vm285_vm1, %v654_v14, 0 }
  0xa2   : > { %2577 = vmatprep.subr.msk.bf16.mxu0 %vm285_vm1, %v657_v16  ;;  %v775_v18 = vpop.permute.xlu1 %774  ;;  %v3192_v16 = vsub.s32 0, %v3025_v3 }
  0xa3   : > { %2639 = vmatmul.mubr.msk.bf16.vlgmr.msra.gmra.mrb[0].mxu1 %vm281_vm2, %v2572_v13 }
  0xa4   : > { %2643 = vmatpush3.bf16.msra.mxu1 %v668_v17  ;;  %2644 = vmatprep.mubr.msk.bf16.mxu1 %vm2921_vm0, %v2920_v4  ;;  %v777_v20 = vpop.permute.xlu0 %776 }
  0xa5   : > { %2648 = vmatprep.subr.bf16.mxu1 %v2920_v4  ;;  %v781_v25 = vsel %vm780_vm7, %v775_v18, %v777_v20 }
  0xa6   : > { %2574 = vmatmul.mubr.msk.bf16.vlgmr.msra.gmra.mrb[0].mxu0 %vm281_vm2, %v2572_v13  ;;  %v779_v21 = vpop.permute.xlu1 %778  ;;  %v787_v29 = vsel %vm285_vm1, %v781_v25, 0 }
  0xa7   : > { %671 = vmatpush1.bf16.msra.mxu0 %v662_v19  ;;  %702 = vmatprep.mubr.bf16.mxu0 %v2922_v6  ;;  %v782_v22 = vsel %vm780_vm7, %v777_v20, %v779_v21  ;;  %v793_v26 = vsel %vm285_vm1, %v779_v21, 0 }
  0xa8   : > { %2581 = vmatprep.subr.msk.bf16.mxu0 %vm285_vm1, %v782_v22  ;;  %v900_v23 = vpop.permute.xlu0 %899 }
  0xaa   : > { %v902_v28 = vpop.permute.xlu1 %901 }
  0xab   : > { %v906_v33 = vsel %vm905_vm8, %v900_v23, %v902_v28 }
  0xac   : > { %v904_v27 = vpop.permute.xlu0 %903  ;;  %v912_v37 = vsel %vm285_vm1, %v906_v33, 0 }
  0xad   : > { %v907_v30 = vsel %vm905_vm8, %v902_v28, %v904_v27  ;;  %v918_v34 = vsel %vm285_vm1, %v904_v27, 0 }
  0xae   : > { %v1025_v31 = vpop.permute.xlu1 %1024 }
  0xaf   : > { %2645 = vmatmul.mubr.msk.bf16.vlgmr.msra.gmra.mrb[0].mxu1 %vm281_vm2, %v2576_v24 }
  0xb0   : > { %2649 = vmatpush3.bf16.msra.mxu1 %v793_v26  ;;  %2650 = vmatprep.mubr.msk.bf16.mxu1 %vm2921_vm0, %v2920_v4  ;;  %v1027_v35 = vpop.permute.xlu0 %1026 }
  0xb1   : > { %2654 = vmatprep.subr.bf16.mxu1 %v2920_v4  ;;  %v1031_v41 = vsel %vm1030_vm9, %v1025_v31, %v1027_v35 }
  0xb2   : > { %2578 = vmatmul.mubr.msk.bf16.vlgmr.msra.gmra.mrb[0].mxu0 %vm281_vm2, %v2576_v24  ;;  %v1029_v36 = vpop.permute.xlu1 %1028  ;;  %v1037_v45 = vsel %vm285_vm1, %v1031_v41, 0 }
  0xb3   : > { %796 = vmatpush1.bf16.msra.mxu0 %v787_v29  ;;  %827 = vmatprep.mubr.bf16.mxu0 %v2922_v6  ;;  %v1032_v38 = vsel %vm1030_vm9, %v1027_v35, %v1029_v36  ;;  %v1043_v42 = vsel %vm285_vm1, %v1029_v36, 0 }
  0xb4   : > { %2585 = vmatprep.subr.msk.bf16.mxu0 %vm285_vm1, %v907_v30  ;;  %v1150_v39 = vpop.permute.xlu0 %1149 }
  0xb6   : > { %v1152_v44 = vpop.permute.xlu1 %1151 }
  0xb7   : > { %v1156_v49 = vsel %vm1155_vm10, %v1150_v39, %v1152_v44  ;;  %v3232_v39 = vsub.s32 1, %v3025_v3 }
  0xb8   : > { %v1154_v43 = vpop.permute.xlu0 %1153  ;;  %v1162_v53 = vsel %vm285_vm1, %v1156_v49, 0 }
  0xb9   : > { %v1157_v46 = vsel %vm1155_vm10, %v1152_v44, %v1154_v43  ;;  %v1168_v50 = vsel %vm285_vm1, %v1154_v43, 0 }
  0xba   : > { %v1275_v47 = vpop.permute.xlu1 %1274 }
  0xbb   : > { %2651 = vmatmul.mubr.msk.bf16.vlgmr.msra.gmra.mrb[0].mxu1 %vm281_vm2, %v2580_v32 }
  0xbc   : > { %2655 = vmatpush3.bf16.msra.mxu1 %v918_v34  ;;  %2656 = vmatprep.mubr.msk.bf16.mxu1 %vm2921_vm0, %v2920_v4  ;;  %v1277_v51 = vpop.permute.xlu0 %1276 }
  0xbd   : > { %2660 = vmatprep.subr.bf16.mxu1 %v2920_v4  ;;  %v1281_v56 = vsel %vm1280_vm11, %v1275_v47, %v1277_v51 }
  0xbe   : > { %2582 = vmatmul.mubr.msk.bf16.vlgmr.msra.gmra.mrb[0].mxu0 %vm281_vm2, %v2580_v32  ;;  %v1279_v52 = vpop.permute.xlu1 %1278  ;;  %v1287_v58 = vsel %vm285_vm1, %v1281_v56, 0 }
  0xbf   : > { %921 = vmatpush1.bf16.msra.mxu0 %v912_v37  ;;  %952 = vmatprep.mubr.bf16.mxu0 %v2922_v6  ;;  %v1282_v54 = vsel %vm1280_vm11, %v1277_v51, %v1279_v52  ;;  %v1293_v57 = vsel %vm285_vm1, %v1279_v52, 0 }
  0xc0   : > { %2589 = vmatprep.subr.msk.bf16.mxu0 %vm285_vm1, %v1032_v38 }
  0xc7   : > { %2657 = vmatmul.mubr.msk.bf16.vlgmr.msra.gmra.mrb[0].mxu1 %vm281_vm2, %v2584_v40 }
  0xc8   : > { %2661 = vmatpush3.bf16.msra.mxu1 %v1043_v42  ;;  %2662 = vmatprep.mubr.msk.bf16.mxu1 %vm2921_vm0, %v2920_v4 }
  0xc9   : > { %2666 = vmatprep.subr.bf16.mxu1 %v2920_v4 }
  0xca   : > { %2586 = vmatmul.mubr.msk.bf16.vlgmr.msra.gmra.mrb[0].mxu0 %vm281_vm2, %v2584_v40 }
  0xcb   : > { %1046 = vmatpush1.bf16.msra.mxu0 %v1037_v45  ;;  %1077 = vmatprep.mubr.bf16.mxu0 %v2922_v6 }
  0xcc   : > { %2593 = vmatprep.subr.msk.bf16.mxu0 %vm285_vm1, %v1157_v46 }
  0xcd   : > { %v1393_v5 = vpop.permute.xlu0 %1392 }
  0xd3   : > { %2663 = vmatmul.mubr.msk.bf16.vlgmr.msra.gmra.mrb[0].mxu1 %vm281_vm2, %v2588_v48 }
  0xd4   : > { %2667 = vmatpush3.bf16.msra.mxu1 %v1168_v50  ;;  %2668 = vmatprep.mubr.msk.bf16.mxu1 %vm2921_vm0, %v2920_v4 }
  0xd5   : > { %2672 = vmatprep.subr.bf16.mxu1 %v2920_v4 }
  0xd6   : > { %2590 = vmatmul.mubr.msk.bf16.vlgmr.msra.gmra.mrb[0].mxu0 %vm281_vm2, %v2588_v48 }
  0xd7   : > { %1171 = vmatpush1.bf16.msra.mxu0 %v1162_v53  ;;  %1202 = vmatprep.mubr.bf16.mxu0 %v2922_v6 }
  0xd8   : > { %2597 = vmatprep.subr.msk.bf16.mxu0 %vm285_vm1, %v1282_v54 }
  0xdf   : > { %2669 = vmatmul.mubr.msk.bf16.vlgmr.msra.gmra.mrb[0].mxu1 %vm281_vm2, %v2592_v55 }
  0xe0   : > { %2673 = vmatpush3.bf16.msra.mxu1 %v1293_v57  ;;  %2674 = vmatprep.mubr.msk.bf16.mxu1 %vm2921_vm0, %v2920_v4 }
  0xe2   : > { %2594 = vmatmul.mubr.msk.bf16.vlgmr.msra.gmra.mrb[0].mxu0 %vm281_vm2, %v2592_v55 }
  0xe3   : > { %1296 = vmatpush1.bf16.msra.mxu0 %v1287_v58  ;;  %1327 = vmatprep.mubr.bf16.mxu0 %v2922_v6 }
  0xeb   : > { %2675 = vmatmul.mubr.msk.bf16.vlgmr.msra.gmra.mrb[0].mxu1 %vm281_vm2, %v2596_v59 }
  0xee   : > { %2598 = vmatmul.mubr.msk.bf16.vlgmr.msra.gmra.mrb[0].mxu0 %vm281_vm2, %v2596_v59 }
 0x1be   : > { %v1370_v63 = vpop.f32.mrb[0].mxu1 }
 0x1bf   : > { %v2680_v4 = vadd.f32 %v1370_v63, %v261_v62  ;;  %v2676_v0 = vpop.f32.mrb[1].mxu1 }
 0x1c0   : > { %v1373_v2 = vpop.f32.mrb[2].mxu1 }
 0x1c1   : > { %1382 = vst.msk [vmem:[#allocation2 + $0x10] sm:$0xff] %vm257_vm3, %v2680_v4  ;;  %v1329_v6 = vpop.f32.mrb[0].mxu0  ;;  %v2677_v7 = vpop.f32.mrb[3].mxu1 }
 0x1c2   : > { %v1331_v8 = vpop.f32.mrb[1].mxu0  ;;  %v1395_v12 = vadd.f32 %v1393_v5, %v1329_v6 }
 0x1c3   : > { %v1333_v9 = vpop.f32.mrb[2].mxu0  ;;  %v1396_v13 = vadd.f32 %v1393_v5, %v1331_v8 }
 0x1c4   : > { %v1334_v11 = vpop.f32.mrb[3].mxu0  ;;  %v1398_v14 = vmax.f32 %v1395_v12, 0.0 }
 0x1c5   : > { %v3189_v15 = vmax.f32 %v1396_v13, 0.0 }
 0x1c6   : > { %v1402_v18 = vcombine.high %v1398_v14, %v1398_v14  ;;  %v1409_v19 = vrot.slane %v1398_v14, %v3185_v10 }
 0x1c7   : > { %v1693_v21 = vcombine.low %v1398_v14, %v3189_v15  ;;  %v1694_v22 = vcombine.high %v1398_v14, %v3189_v15  ;;  %v1871_v32 = vrot.slane %v3189_v15, %v3185_v10  ;;  %v1864_v49 = vcombine.high %v3189_v15, %v3189_v15 }
 0x1c8   : > { %v1388_v17 = vld [vmem:[#allocation2 + $0x10] sm:$0xff]  ;;  %v1416_v23 = vrot.slane %v1402_v18, %v3185_v10  ;;  %v1417_v24 = vcombine.high %v1409_v19, %v1409_v19  ;;  %v1425_v25 = vrot.slane %v1409_v19, %v3185_v10 }
 0x1c9   : > { %v1397_v20 = vadd.f32 %v1393_v5, %v1388_v17  ;;  %v1701_v34 = vrot.slane %v1693_v21, %v3185_v10  ;;  %v1708_v38 = vrot.slane %v1694_v22, %v3185_v10  ;;  %v1879_v45 = vcombine.high %v1871_v32, %v1871_v32 }
 0x1ca   : > { %v1418_v27 = vcombine.high %v1416_v23, %v1416_v23  ;;  %v3200_v28 = vrot.slane %v1416_v23, %v3185_v10  ;;  %v1439_v29 = vrot.slane %v1417_v24, %v3185_v10  ;;  %1460 = vst.msk [vmem:[%s3203_s29] sm:$0x1] %vm1459_vm12, %v1425_v25  ;;  %v3208_v30 = vrot.slane %v1425_v25, %v3192_v16 }
 0x1cb   : > { %v1400_v26 = vmax.f32 %v1397_v20, 0.0  ;;  %v3235_v41 = vcombine.high %v1425_v25, %v1425_v25  ;;  %v3246_v47 = vrot.slane %v1701_v34, %v3185_v10  ;;  %v3260_v51 = vrot.slane %v1708_v38, %v3185_v10 }
 0x1cc   : > { %v3214_v33 = vrot.slane %v1418_v27, %v3185_v10  ;;  %1461 = vst.msk [vmem:[%s3203_s29 + $0x10] sm:$0x1] %vm1459_vm12, %v1439_v29  ;;  %1464 = vst.msk [vmem:[%s3203_s29 + $0x40] sm:$0x1] %vm1459_vm12, %v3200_v28  ;;  %1500 = vrot.lane.b32.xlu1 %v3208_v30, %s2925_s8  ;;  %v3239_v42 = vrot.slane %v3200_v28, %v3192_v16  ;;  %v3264_v54 = vrot.slane %v1439_v29, %v3192_v16 }
 0x1cd   : > { %v2315_v31 = vrot.slane %v1400_v26, %v3185_v10  ;;  %v2308_v35 = vcombine.high %v1400_v26, %v1400_v26  ;;  %v2138_v46 = vcombine.low %v3189_v15, %v1400_v26  ;;  %1462 = vst.msk [vmem:[%s3203_s29 + $0x20] sm:$0x1] %vm1459_vm12, %v3235_v41  ;;  %v2139_v48 = vcombine.high %v3189_v15, %v1400_v26 }
 0x1ce   : > { %1465 = vst.msk [vmem:[%s3203_s29 + $0x50] sm:$0x1] %vm1459_vm12, %v3214_v33  ;;  %v3267_v55 = vrot.slane %v1871_v32, %v3185_v10  ;;  %v3272_v58 = vrot.slane %v1879_v45, %v3185_v10  ;;  %v1449_v61 = vcombine.high %v1439_v29, %v1439_v29  ;;  %v3290_v0 = vrot.slane %v3214_v33, %v3192_v16 }
 0x1cf   : > { %v3225_v36 = vrot.slane %v2315_v31, %v3185_v10  ;;  %v2323_v37 = vcombine.high %v2315_v31, %v2315_v31  ;;  %v2322_v40 = vrot.slane %v2308_v35, %v3185_v10  ;;  %v2146_v52 = vrot.slane %v2138_v46, %v3185_v10 }
 0x1d0   : > { %v2153_v56 = vrot.slane %v2139_v48, %v3185_v10  ;;  %v3295_v2 = vrot.slane %v1449_v61, %v3192_v16  ;;  %1463 = vst.msk [vmem:[%s3203_s29 + $0x30] sm:$0x1] %vm1459_vm12, %v1449_v61  ;;  %v1746_v5 = vrot.slane %v3246_v47, %v3192_v16  ;;  %v1778_v6 = vrot.slane %v3260_v51, %v3192_v16 }
 0x1d1   : > { %v2360_v43 = vrot.slane %v3225_v36, %v3192_v16  ;;  %v2345_v44 = vrot.slane %v2323_v37, %v3185_v10  ;;  %v3249_v3 = vrot.slane %v2322_v40, %v3185_v10  ;;  %v2324_v57 = vcombine.high %v2322_v40, %v2322_v40 }
 0x1d2   : > { %v3275_v59 = vrot.slane %v2146_v52, %v3185_v10  ;;  %v3283_v63 = vrot.slane %v2153_v56, %v3185_v10  ;;  %v2154_v1 = vcombine.high %v2146_v52, %v2146_v52  ;;  %v2155_v7 = vcombine.high %v2153_v56, %v2153_v56 }
 0x1d3   : > { %2389 = vrot.lane.b32.xlu0 %v2360_v43, %s2932_s30  ;;  %v2364_v50 = vrot.slane %v2345_v44, %v3192_v16  ;;  %v2355_v53 = vcombine.high %v2345_v44, %v2345_v44  ;;  %v2354_v62 = vcombine.high %v3249_v3, %v3249_v3  ;;  %v3286_v4 = vrot.slane %v2324_v57, %v3185_v10 }
 0x1d4   : > { %v1909_v11 = vcombine.high %v3267_v55, %v3267_v55  ;;  %v1878_v12 = vrot.slane %v1864_v49, %v3185_v10  ;;  %v1709_v13 = vcombine.high %v1701_v34, %v1701_v34  ;;  %v3314_v14 = vcombine.high %v3246_v47, %v3246_v47 }
 0x1d5   : > { %2391 = vrot.lane.b32.xlu1 %v2364_v50, %s2932_s30  ;;  %v3278_v60 = vrot.slane %v2355_v53, %v3192_v16  ;;  %v2356_v8 = vcombine.high %v3286_v4, %v3286_v4  ;;  %v2380_v9 = vrot.slane %v3286_v4, %v3192_v16  ;;  %v1710_v15 = vcombine.high %v1708_v38, %v1708_v38 }
 0x1d6   : > { %v3317_v17 = vrot.slane %v1909_v11, %v3192_v16  ;;  %v3321_v18 = vcombine.high %v3260_v51, %v3260_v51  ;;  %v1911_v19 = vcombine.high %v3272_v58, %v3272_v58  ;;  %v2191_v20 = vrot.slane %v3275_v59, %v3192_v16 }
 0x1d7   : > { %1532 = vrot.lane.b32.xlu0 %v3208_v30, %s2928_s11  ;;  %v1894_v21 = vrot.slane %v1878_v12, %v3185_v10  ;;  %v3331_v22 = vrot.slane %v1709_v13, %v3185_v10  ;;  %v1766_v23 = vrot.slane %v3314_v14, %v3232_v39  ;;  %v3336_v24 = vrot.slane %v1710_v15, %v3185_v10 }
 0x1d8   : > { %v1798_v25 = vrot.slane %v3321_v18, %v3232_v39  ;;  %v3341_v26 = vrot.slane %v1911_v19, %v3192_v16  ;;  %v1880_v27 = vcombine.high %v1878_v12, %v1878_v12  ;;  %v2223_v29 = vrot.slane %v3283_v63, %v3192_v16 }
 0x1d9   : > { %1502 = vrot.lane.b32.xlu1 %v3264_v54, %s2925_s8  ;;  %v3348_v31 = vrot.slane %v1894_v21, %v3192_v16  ;;  %v1758_v32 = vrot.slane %v3331_v22, %v3232_v39  ;;  %v1790_v34 = vrot.slane %v3336_v24, %v3232_v39  ;;  %v1448_v35 = vcombine.high %v3200_v28, %v3200_v28 }
 0x1da   : > { %v1908_v37 = vrot.slane %v1880_v27, %v3185_v10  ;;  %v3358_v38 = vrot.slane %v2154_v1, %v3185_v10  ;;  %v3362_v40 = vcombine.high %v3275_v59, %v3275_v59  ;;  %v1754_v43 = vrot.slane %v3331_v22, %v3192_v16 }
 0x1db   : > { %1564 = vrot.lane.b32.xlu0 %v3208_v30, %s2933_s4  ;;  %v3369_v44 = vrot.slane %v1448_v35, %v3192_v16  ;;  %1466 = vst.msk [vmem:[%s3203_s29 + $0x60] sm:$0x1] %vm1459_vm12, %v1448_v35  ;;  %v3374_v28 = vrot.slane %v2155_v7, %v3185_v10  ;;  %v1762_v45 = vrot.slane %v3314_v14, %v3192_v16 }
 0x1dc   : > { %v3380_v46 = vcombine.high %v3283_v63, %v3283_v63  ;;  %v3383_v48 = vrot.slane %v1908_v37, %v3192_v16  ;;  %v2203_v49 = vrot.slane %v3358_v38, %v3232_v39  ;;  %v2211_v50 = vrot.slane %v3362_v40, %v3232_v39 }
 0x1dd   : > { %1534 = vrot.lane.b32.xlu1 %v3264_v54, %s2928_s11  ;;  %v1786_v10 = vrot.slane %v3336_v24, %v3192_v16  ;;  %v2235_v52 = vrot.slane %v3374_v28, %v3232_v39  ;;  %v1794_v56 = vrot.slane %v3321_v18, %v3192_v16  ;;  %v1910_v57 = vcombine.high %v1894_v21, %v1894_v21 }
 0x1de   : > { %v2243_v53 = vrot.slane %v3380_v46, %v3232_v39  ;;  %v1450_v61 = vcombine.high %v3214_v33, %v3214_v33  ;;  %v2199_v1 = vrot.slane %v3358_v38, %v3192_v16  ;;  %v3407_v11 = vcombine.high %v3331_v22, %v3331_v22 }
 0x1df   : > { %1596 = vrot.lane.b32.xlu0 %v3208_v30, %s2934_s5  ;;  %v3412_v12 = vrot.slane %v1910_v57, %v3192_v16  ;;  %v3418_v13 = vcombine.high %v3336_v24, %v3336_v24  ;;  %v1912_v27 = vcombine.high %v1908_v37, %v1908_v37  ;;  %v3439_v33 = vcombine.high %v3358_v38, %v3358_v38 }
 0x1e0   : > { %v3423_v19 = vrot.slane %v1450_v61, %v3192_v16  ;;  %1467 = vst.msk [vmem:[%s3203_s29 + $0x70] sm:$0x1] %vm1459_vm12, %v1450_v61  ;;  %v1774_v21 = vrot.slane %v3407_v11, %v3232_v39  ;;  %v3443_v61 = vcombine.high %v3374_v28, %v3374_v28  ;;  %v3452_v35 = vrot.slane %v2354_v62, %v3192_v16 }
 0x1e1   : > { %1566 = vrot.lane.b32.xlu1 %v3264_v54, %s2933_s4  ;;  %v3446_v37 = vrot.slane %v1912_v27, %v3192_v16  ;;  %v3458_v15 = vrot.slane %v2356_v8, %v3192_v16  ;;  %v2215_v27 = vrot.slane %v3439_v33, %v3192_v16  ;;  %v2219_v62 = vrot.slane %v3439_v33, %v3232_v39 }
 0x1e2   : > { %v2247_v57 = vrot.slane %v3443_v61, %v3192_v16  ;;  %v1916_v8 = vrot.slane %v3267_v55, %v3192_v16  ;;  %v1782_v55 = vrot.slane %v3260_v51, %v3232_v39  ;;  %v1479_v7 = vrot.slane %v3235_v41, %v3192_v16 }
 0x1e3   : > { %1628 = vrot.lane.b32.xlu0 %v3208_v30, %s2935_s6  ;;  %v2227_v41 = vrot.slane %v3283_v63, %v3232_v39 }
 0x1e5   : > { %1598 = vrot.lane.b32.xlu1 %v3264_v54, %s2934_s5 }
 0x1e7   : > { %1660 = vrot.lane.b32.xlu0 %v3208_v30, %s2936_s7  ;;  %v1750_v30 = vrot.slane %v3246_v47, %v3232_v39 }
 0x1e9   : > { %1630 = vrot.lane.b32.xlu1 %v3264_v54, %s2935_s6 }
 0x1eb   : > { %1945 = vrot.lane.b32.xlu0 %v1916_v8, %s2937_s9 }
 0x1ed   : > { %1662 = vrot.lane.b32.xlu1 %v3264_v54, %s2936_s7  ;;  %v1920_v54 = vrot.slane %v3272_v58, %v3192_v16  ;;  %v2376_v58 = vrot.slane %v3249_v3, %v3192_v16 }
 0x1ef   : > { %1977 = vrot.lane.b32.xlu0 %v1916_v8, %s2938_s10 }
 0x1f1   : > { %1809 = vrot.lane.b32.xlu1 %v1750_v30, %s2939_s18  ;;  %v2353_v30 = vcombine.high %v3225_v36, %v3225_v36  ;;  %v2195_v36 = vrot.slane %v3275_v59, %v3232_v39 }
 0x1f3   : > { %2009 = vrot.lane.b32.xlu0 %v1916_v8, %s2940_s19 }
 0x1f5   : > { %1825 = vrot.lane.b32.xlu1 %v1782_v55, %s2939_s18  ;;  %v2368_v55 = vrot.slane %v2353_v30, %v3192_v16 }
 0x1f7   : > { %2041 = vrot.lane.b32.xlu0 %v1916_v8, %s2941_s21 }
 0x1f9   : > { %1947 = vrot.lane.b32.xlu1 %v1920_v54, %s2937_s9 }
 0x1fb   : > { %2073 = vrot.lane.b32.xlu0 %v1916_v8, %s2942_s23 }
 0x1fd   : > { %1979 = vrot.lane.b32.xlu1 %v1920_v54, %s2938_s10 }
 0x1ff   : > { %2105 = vrot.lane.b32.xlu0 %v1916_v8, %s2943_s26 }
 0x201   : > { %2011 = vrot.lane.b32.xlu1 %v1920_v54, %s2940_s19 }
 0x203   : > { %2393 = vrot.lane.b32.xlu0 %v2368_v55, %s2932_s30 }
 0x205   : > { %2043 = vrot.lane.b32.xlu1 %v1920_v54, %s2941_s21 }
 0x207   : > { %2397 = vrot.lane.b32.xlu0 %v2376_v58, %s2932_s30 }
 0x209   : > { %2075 = vrot.lane.b32.xlu1 %v1920_v54, %s2942_s23 }
 0x20b   : > { %1504 = vrot.lane.b32.xlu0 %v1479_v7, %s2925_s8 }
 0x20d   : > { %2107 = vrot.lane.b32.xlu1 %v1920_v54, %s2943_s26 }
 0x20f   : > { %1508 = vrot.lane.b32.xlu0 %v3239_v42, %s2925_s8 }
 0x211   : > { %2254 = vrot.lane.b32.xlu1 %v2195_v36, %s2944_s28 }
 0x213   : > { %1536 = vrot.lane.b32.xlu0 %v1479_v7, %s2928_s11 }
 0x215   : > { %2270 = vrot.lane.b32.xlu1 %v2227_v41, %s2944_s28 }
 0x217   : > { %1540 = vrot.lane.b32.xlu0 %v3239_v42, %s2928_s11 }
 0x219   : > { %2395 = vrot.lane.b32.xlu1 %v3278_v60, %s2932_s30 }
 0x21b   : > { %1568 = vrot.lane.b32.xlu0 %v1479_v7, %s2933_s4 }
 0x21d   : > { %2399 = vrot.lane.b32.xlu1 %v2380_v9, %s2932_s30 }
 0x21f   : > { %1572 = vrot.lane.b32.xlu0 %v3239_v42, %s2933_s4 }
 0x221   : > { %1506 = vrot.lane.b32.xlu1 %v3295_v2, %s2925_s8 }
 0x223   : > { %1600 = vrot.lane.b32.xlu0 %v1479_v7, %s2934_s5 }
 0x225   : > { %1510 = vrot.lane.b32.xlu1 %v3290_v0, %s2925_s8 }
 0x227   : > { %1604 = vrot.lane.b32.xlu0 %v3239_v42, %s2934_s5 }
 0x229   : > { %1538 = vrot.lane.b32.xlu1 %v3295_v2, %s2928_s11 }
 0x22b   : > { %1632 = vrot.lane.b32.xlu0 %v1479_v7, %s2935_s6 }
 0x22d   : > { %1542 = vrot.lane.b32.xlu1 %v3290_v0, %s2928_s11 }
 0x22f   : > { %1636 = vrot.lane.b32.xlu0 %v3239_v42, %s2935_s6 }
 0x231   : > { %1570 = vrot.lane.b32.xlu1 %v3295_v2, %s2933_s4 }
 0x233   : > { %1664 = vrot.lane.b32.xlu0 %v1479_v7, %s2936_s7 }
 0x235   : > { %1574 = vrot.lane.b32.xlu1 %v3290_v0, %s2933_s4 }
 0x237   : > { %1668 = vrot.lane.b32.xlu0 %v3239_v42, %s2936_s7 }
 0x239   : > { %1602 = vrot.lane.b32.xlu1 %v3295_v2, %s2934_s5 }
 0x23b   : > { %1807 = vrot.lane.b32.xlu0 %v1746_v5, %s2939_s18 }
 0x23d   : > { %1606 = vrot.lane.b32.xlu1 %v3290_v0, %s2934_s5 }
 0x23e   : > { %v1501_v3 = vpop.permute.xlu1 %1500 }
 0x23f   : > { %1823 = vrot.lane.b32.xlu0 %v1778_v6, %s2939_s18  ;;  %1524 = vst.msk [vmem:[%s3203_s29 + $0x1] sm:$0x1] %vm1459_vm12, %v1501_v3 }
 0x241   : > { %1634 = vrot.lane.b32.xlu1 %v3295_v2, %s2935_s6 }
 0x243   : > { %1949 = vrot.lane.b32.xlu0 %v3317_v17, %s2937_s9 }
 0x245   : > { %v2390_v42 = vpop.permute.xlu0 %2389  ;;  %1638 = vrot.lane.b32.xlu1 %v3290_v0, %s2935_s6 }
 0x246   : > { %2413 = vst.msk [vmem:[%s3203_s29 + $0xf] sm:$0x1] %vm1459_vm12, %v2390_v42 }
 0x247   : > { %1953 = vrot.lane.b32.xlu0 %v3348_v31, %s2937_s9  ;;  %v2392_v47 = vpop.permute.xlu1 %2391 }
 0x248   : > { %2414 = vst.msk [vmem:[%s3203_s29 + $0x1f] sm:$0x1] %vm1459_vm12, %v2392_v47 }
 0x249   : > { %v1533_v51 = vpop.permute.xlu0 %1532  ;;  %1666 = vrot.lane.b32.xlu1 %v3295_v2, %s2936_s7 }
 0x24a   : > { %1556 = vst.msk [vmem:[%s3203_s29 + $0x2] sm:$0x1] %vm1459_vm12, %v1533_v51 }
 0x24b   : > { %1981 = vrot.lane.b32.xlu0 %v3317_v17, %s2938_s10  ;;  %v1503_v60 = vpop.permute.xlu1 %1502 }
 0x24c   : > { %1525 = vst.msk [vmem:[%s3203_s29 + $0x11] sm:$0x1] %vm1459_vm12, %v1503_v60 }
 0x24d   : > { %v1565_v4 = vpop.permute.xlu0 %1564  ;;  %1670 = vrot.lane.b32.xlu1 %v3290_v0, %s2936_s7 }
 0x24e   : > { %1588 = vst.msk [vmem:[%s3203_s29 + $0x3] sm:$0x1] %vm1459_vm12, %v1565_v4 }
 0x24f   : > { %1985 = vrot.lane.b32.xlu0 %v3348_v31, %s2938_s10  ;;  %v1535_v2 = vpop.permute.xlu1 %1534 }
 0x250   : > { %1557 = vst.msk [vmem:[%s3203_s29 + $0x12] sm:$0x1] %vm1459_vm12, %v1535_v2 }
 0x251   : > { %v1597_v5 = vpop.permute.xlu0 %1596  ;;  %1813 = vrot.lane.b32.xlu1 %v1758_v32, %s2939_s18 }
 0x252   : > { %1620 = vst.msk [vmem:[%s3203_s29 + $0x4] sm:$0x1] %vm1459_vm12, %v1597_v5 }
 0x253   : > { %2013 = vrot.lane.b32.xlu0 %v3317_v17, %s2940_s19  ;;  %v1567_v0 = vpop.permute.xlu1 %1566 }
 0x254   : > { %1589 = vst.msk [vmem:[%s3203_s29 + $0x13] sm:$0x1] %vm1459_vm12, %v1567_v0 }
 0x255   : > { %v1629_v6 = vpop.permute.xlu0 %1628  ;;  %1817 = vrot.lane.b32.xlu1 %v1766_v23, %s2939_s18 }
 0x256   : > { %1652 = vst.msk [vmem:[%s3203_s29 + $0x5] sm:$0x1] %vm1459_vm12, %v1629_v6 }
 0x257   : > { %2017 = vrot.lane.b32.xlu0 %v3348_v31, %s2940_s19  ;;  %v1599_v9 = vpop.permute.xlu1 %1598 }
 0x258   : > { %1621 = vst.msk [vmem:[%s3203_s29 + $0x14] sm:$0x1] %vm1459_vm12, %v1599_v9 }
 0x259   : > { %v1661_v32 = vpop.permute.xlu0 %1660  ;;  %1829 = vrot.lane.b32.xlu1 %v1790_v34, %s2939_s18 }
 0x25a   : > { %1684 = vst.msk [vmem:[%s3203_s29 + $0x6] sm:$0x1] %vm1459_vm12, %v1661_v32 }
 0x25b   : > { %2045 = vrot.lane.b32.xlu0 %v3317_v17, %s2941_s21  ;;  %v1631_v23 = vpop.permute.xlu1 %1630 }
 0x25c   : > { %1653 = vst.msk [vmem:[%s3203_s29 + $0x15] sm:$0x1] %vm1459_vm12, %v1631_v23 }
 0x25d   : > { %v1946_v7 = vpop.permute.xlu0 %1945  ;;  %1833 = vrot.lane.b32.xlu1 %v1798_v25, %s2939_s18 }
 0x25e   : > { %1969 = vst.msk [vmem:[%s3203_s29 + $0x8] sm:$0x1] %vm1459_vm12, %v1946_v7 }
 0x25f   : > { %2049 = vrot.lane.b32.xlu0 %v3348_v31, %s2941_s21  ;;  %v1663_v34 = vpop.permute.xlu1 %1662 }
 0x260   : > { %1685 = vst.msk [vmem:[%s3203_s29 + $0x16] sm:$0x1] %vm1459_vm12, %v1663_v34 }
 0x261   : > { %v1978_v8 = vpop.permute.xlu0 %1977  ;;  %1951 = vrot.lane.b32.xlu1 %v3341_v26, %s2937_s9 }
 0x262   : > { %2001 = vst.msk [vmem:[%s3203_s29 + $0x9] sm:$0x1] %vm1459_vm12, %v1978_v8 }
 0x263   : > { %2077 = vrot.lane.b32.xlu0 %v3317_v17, %s2942_s23  ;;  %v3635_v25 = vpop.permute.xlu1 %1809 }
 0x265   : > { %v2010_v54 = vpop.permute.xlu0 %2009  ;;  %1955 = vrot.lane.b32.xlu1 %v3383_v48, %s2937_s9 }
 0x266   : > { %2033 = vst.msk [vmem:[%s3203_s29 + $0xa] sm:$0x1] %vm1459_vm12, %v2010_v54 }
 0x267   : > { %2081 = vrot.lane.b32.xlu0 %v3348_v31, %s2942_s23  ;;  %v3643_v30 = vpop.permute.xlu1 %1825 }
 0x269   : > { %v2042_v55 = vpop.permute.xlu0 %2041  ;;  %1983 = vrot.lane.b32.xlu1 %v3341_v26, %s2938_s10 }
 0x26a   : > { %2065 = vst.msk [vmem:[%s3203_s29 + $0xb] sm:$0x1] %vm1459_vm12, %v2042_v55 }
 0x26b   : > { %2252 = vrot.lane.b32.xlu0 %v2191_v20, %s2944_s28  ;;  %v1948_v58 = vpop.permute.xlu1 %1947 }
 0x26c   : > { %1970 = vst.msk [vmem:[%s3203_s29 + $0x18] sm:$0x1] %vm1459_vm12, %v1948_v58  ;;  %v4117_v58 = vrot.slane %v3380_v46, %v3192_v16  ;;  %v4118_v46 = vrot.slane %v3407_v11, %v3192_v16 }
 0x26d   : > { %v2074_v36 = vpop.permute.xlu0 %2073  ;;  %1987 = vrot.lane.b32.xlu1 %v3383_v48, %s2938_s10 }
 0x26e   : > { %2097 = vst.msk [vmem:[%s3203_s29 + $0xc] sm:$0x1] %vm1459_vm12, %v2074_v36 }
 0x26f   : > { %2268 = vrot.lane.b32.xlu0 %v2223_v29, %s2944_s28  ;;  %v1980_v41 = vpop.permute.xlu1 %1979 }
 0x270   : > { %2002 = vst.msk [vmem:[%s3203_s29 + $0x19] sm:$0x1] %vm1459_vm12, %v1980_v41 }
 0x271   : > { %v2106_v59 = vpop.permute.xlu0 %2105  ;;  %2015 = vrot.lane.b32.xlu1 %v3341_v26, %s2940_s19 }
 0x272   : > { %2129 = vst.msk [vmem:[%s3203_s29 + $0xd] sm:$0x1] %vm1459_vm12, %v2106_v59 }
 0x273   : > { %2109 = vrot.lane.b32.xlu0 %v3317_v17, %s2943_s26  ;;  %v2012_v20 = vpop.permute.xlu1 %2011 }
 0x274   : > { %2034 = vst.msk [vmem:[%s3203_s29 + $0x1a] sm:$0x1] %vm1459_vm12, %v2012_v20 }
 0x275   : > { %v2394_v63 = vpop.permute.xlu0 %2393  ;;  %2019 = vrot.lane.b32.xlu1 %v3383_v48, %s2940_s19 }
 0x276   : > { %2415 = vst.msk [vmem:[%s3203_s29 + $0x2f] sm:$0x1] %vm1459_vm12, %v2394_v63 }
 0x277   : > { %2113 = vrot.lane.b32.xlu0 %v3348_v31, %s2943_s26  ;;  %v2044_v29 = vpop.permute.xlu1 %2043 }
 0x278   : > { %2066 = vst.msk [vmem:[%s3203_s29 + $0x1b] sm:$0x1] %vm1459_vm12, %v2044_v29 }
 0x279   : > { %v2398_v3 = vpop.permute.xlu0 %2397  ;;  %2047 = vrot.lane.b32.xlu1 %v3341_v26, %s2941_s21 }
 0x27a   : > { %2417 = vst.msk [vmem:[%s3203_s29 + $0x4f] sm:$0x1] %vm1459_vm12, %v2398_v3 }
 0x27b   : > { %1512 = vrot.lane.b32.xlu0 %v3369_v44, %s2925_s8  ;;  %v2076_v17 = vpop.permute.xlu1 %2075 }
 0x27c   : > { %2098 = vst.msk [vmem:[%s3203_s29 + $0x1c] sm:$0x1] %vm1459_vm12, %v2076_v17 }
 0x27d   : > { %v1505_v42 = vpop.permute.xlu0 %1504  ;;  %2051 = vrot.lane.b32.xlu1 %v3383_v48, %s2941_s21 }
 0x27e   : > { %1526 = vst.msk [vmem:[%s3203_s29 + $0x21] sm:$0x1] %vm1459_vm12, %v1505_v42  ;;  %v4120_v42 = vrot.slane %v3443_v61, %v3232_v39 }
 0x27f   : > { %1544 = vrot.lane.b32.xlu0 %v3369_v44, %s2928_s11  ;;  %v2108_v31 = vpop.permute.xlu1 %2107 }
 0x280   : > { %2130 = vst.msk [vmem:[%s3203_s29 + $0x1d] sm:$0x1] %vm1459_vm12, %v2108_v31 }
 0x281   : > { %v1509_v47 = vpop.permute.xlu0 %1508  ;;  %2079 = vrot.lane.b32.xlu1 %v3341_v26, %s2942_s23 }
 0x282   : > { %1528 = vst.msk [vmem:[%s3203_s29 + $0x41] sm:$0x1] %vm1459_vm12, %v1509_v47 }
 0x283   : > { %1576 = vrot.lane.b32.xlu0 %v3369_v44, %s2933_s4  ;;  %v3703_v51 = vpop.permute.xlu1 %2254 }
 0x285   : > { %v1537_v60 = vpop.permute.xlu0 %1536  ;;  %2083 = vrot.lane.b32.xlu1 %v3383_v48, %s2942_s23 }
 0x286   : > { %1558 = vst.msk [vmem:[%s3203_s29 + $0x22] sm:$0x1] %vm1459_vm12, %v1537_v60 }
 0x287   : > { %1608 = vrot.lane.b32.xlu0 %v3369_v44, %s2934_s5  ;;  %v3711_v4 = vpop.permute.xlu1 %2270 }
 0x289   : > { %v1541_v2 = vpop.permute.xlu0 %1540  ;;  %2258 = vrot.lane.b32.xlu1 %v2203_v49, %s2944_s28 }
 0x28a   : > { %1560 = vst.msk [vmem:[%s3203_s29 + $0x42] sm:$0x1] %vm1459_vm12, %v1541_v2 }
 0x28b   : > { %1640 = vrot.lane.b32.xlu0 %v3369_v44, %s2935_s6  ;;  %v2396_v5 = vpop.permute.xlu1 %2395 }
 0x28c   : > { %2416 = vst.msk [vmem:[%s3203_s29 + $0x3f] sm:$0x1] %vm1459_vm12, %v2396_v5 }
 0x28d   : > { %v1569_v0 = vpop.permute.xlu0 %1568  ;;  %2262 = vrot.lane.b32.xlu1 %v2211_v50, %s2944_s28 }
 0x28e   : > { %1590 = vst.msk [vmem:[%s3203_s29 + $0x23] sm:$0x1] %vm1459_vm12, %v1569_v0 }
 0x28f   : > { %1672 = vrot.lane.b32.xlu0 %v3369_v44, %s2936_s7  ;;  %v2400_v49 = vpop.permute.xlu1 %2399 }
 0x290   : > { %2418 = vst.msk [vmem:[%s3203_s29 + $0x5f] sm:$0x1] %vm1459_vm12, %v2400_v49 }
 0x291   : > { %v1573_v6 = vpop.permute.xlu0 %1572  ;;  %2274 = vrot.lane.b32.xlu1 %v2235_v52, %s2944_s28 }
 0x292   : > { %1592 = vst.msk [vmem:[%s3203_s29 + $0x43] sm:$0x1] %vm1459_vm12, %v1573_v6 }
 0x293   : > { %1811 = vrot.lane.b32.xlu0 %v1754_v43, %s2939_s18  ;;  %v1507_v50 = vpop.permute.xlu1 %1506 }
 0x294   : > { %1527 = vst.msk [vmem:[%s3203_s29 + $0x31] sm:$0x1] %vm1459_vm12, %v1507_v50 }
 0x295   : > { %v1601_v44 = vpop.permute.xlu0 %1600  ;;  %2278 = vrot.lane.b32.xlu1 %v2243_v53, %s2944_s28 }
 0x296   : > { %1622 = vst.msk [vmem:[%s3203_s29 + $0x24] sm:$0x1] %vm1459_vm12, %v1601_v44 }
 0x297   : > { %1815 = vrot.lane.b32.xlu0 %v1762_v45, %s2939_s18  ;;  %v1511_v22 = vpop.permute.xlu1 %1510 }
 0x298   : > { %1529 = vst.msk [vmem:[%s3203_s29 + $0x51] sm:$0x1] %vm1459_vm12, %v1511_v22 }
 0x299   : > { %v1605_v43 = vpop.permute.xlu0 %1604  ;;  %2111 = vrot.lane.b32.xlu1 %v3341_v26, %s2943_s26 }
 0x29a   : > { %1624 = vst.msk [vmem:[%s3203_s29 + $0x44] sm:$0x1] %vm1459_vm12, %v1605_v43 }
 0x29b   : > { %1827 = vrot.lane.b32.xlu0 %v1786_v10, %s2939_s18  ;;  %v1539_v52 = vpop.permute.xlu1 %1538 }
 0x29c   : > { %1559 = vst.msk [vmem:[%s3203_s29 + $0x32] sm:$0x1] %vm1459_vm12, %v1539_v52 }
 0x29d   : > { %v1633_v14 = vpop.permute.xlu0 %1632  ;;  %2115 = vrot.lane.b32.xlu1 %v3383_v48, %s2943_s26 }
 0x29e   : > { %1654 = vst.msk [vmem:[%s3203_s29 + $0x25] sm:$0x1] %vm1459_vm12, %v1633_v14 }
 0x29f   : > { %1831 = vrot.lane.b32.xlu0 %v1794_v56, %s2939_s18  ;;  %v1543_v26 = vpop.permute.xlu1 %1542 }
 0x2a0   : > { %1561 = vst.msk [vmem:[%s3203_s29 + $0x52] sm:$0x1] %vm1459_vm12, %v1543_v26 }
 0x2a1   : > { %v1637_v24 = vpop.permute.xlu0 %1636  ;;  %1514 = vrot.lane.b32.xlu1 %v3423_v19, %s2925_s8  ;;  %s2605_s8 = sshll.u32 %s2909_s15, 11 }
 0x2a2   : > { %1656 = vst.msk [vmem:[%s3203_s29 + $0x45] sm:$0x1] %vm1459_vm12, %v1637_v24 }
 0x2a3   : > { %1957 = vrot.lane.b32.xlu0 %v3412_v12, %s2937_s9  ;;  %v1571_v45 = vpop.permute.xlu1 %1570 }
 0x2a4   : > { %1591 = vst.msk [vmem:[%s3203_s29 + $0x33] sm:$0x1] %vm1459_vm12, %v1571_v45 }
 0x2a5   : > { %v1665_v48 = vpop.permute.xlu0 %1664  ;;  %1546 = vrot.lane.b32.xlu1 %v3423_v19, %s2928_s11  ;;  %s2438_s11 = sshll.u32 %s3203_s29, 4  ;;  %s4056_s11 = int_to_ptr.vmem [resolvable:$true] %s2438_s11 }
 0x2a6   : > { %1686 = vst.msk [vmem:[%s3203_s29 + $0x26] sm:$0x1] %vm1459_vm12, %v1665_v48  ;;  %s2839_s15 = scalar_lea.vmem %s4056_s11, 2048 }
 0x2a7   : > { %1989 = vrot.lane.b32.xlu0 %v3412_v12, %s2938_s10  ;;  %v1575_v18 = vpop.permute.xlu1 %1574  ;;  %p2840_p12 = scmp.ne.s32.totalorder %s4056_s11, %s2839_s15 }
 0x2a8   : > { %1593 = vst.msk [vmem:[%s3203_s29 + $0x53] sm:$0x1] %vm1459_vm12, %v1575_v18 }
 0x2a9   : > { %v1669_v10 = vpop.permute.xlu0 %1668  ;;  %1578 = vrot.lane.b32.xlu1 %v3423_v19, %s2933_s4  ;;  %p2841_p13 = pnand %p2840_p12, %p3008_p4 }
 0x2aa   : > { %1688 = vst.msk [vmem:[%s3203_s29 + $0x46] sm:$0x1] %vm1459_vm12, %v1669_v10 }
 0x2ab   : > { %2021 = vrot.lane.b32.xlu0 %v3412_v12, %s2940_s19  ;;  %v1603_v53 = vpop.permute.xlu1 %1602  ;;  %p2842_p0 = pneg %p2841_p13 }
 0x2ac   : > { %1623 = vst.msk [vmem:[%s3203_s29 + $0x34] sm:$0x1] %vm1459_vm12, %v1603_v53 }
 0x2ad   : > { %v1808_v56 = vpop.permute.xlu0 %1807  ;;  %1610 = vrot.lane.b32.xlu1 %v3423_v19, %s2934_s5  ;;  %s4054_s5 = scalar_lea.hbm %s4111_s3, %s2605_s8 }
 0x2ae   : > { %v1840_v9 = vsel %vm1839_vm13, %v1808_v56, %v3635_v25 }
 0x2af   : > { %1856 = vst.msk [vmem:[%s3203_s29 + $0x7] sm:$0x1] %vm1459_vm12, %v1840_v9  ;;  %2053 = vrot.lane.b32.xlu0 %v3412_v12, %s2941_s21  ;;  %v1607_v32 = vpop.permute.xlu1 %1606 }
 0x2b0   : > { %1625 = vst.msk [vmem:[%s3203_s29 + $0x54] sm:$0x1] %vm1459_vm12, %v1607_v32 }
 0x2b1   : > { %v1824_v23 = vpop.permute.xlu0 %1823  ;;  %1642 = vrot.lane.b32.xlu1 %v3423_v19, %s2935_s6  ;;  %s4062_s6 = scalar_lea.sflag [#allocation4], %s226_s27 }
 0x2b2   : > { %v1844_v7 = vsel %vm1839_vm13, %v1824_v23, %v3643_v30  ;;  %v4115_v30 = vrot.slane %v3418_v13, %v3232_v39 }
 0x2b3   : > { %1860 = vst.msk [vmem:[%s3203_s29 + $0x47] sm:$0x1] %vm1459_vm12, %v1844_v7  ;;  %2085 = vrot.lane.b32.xlu0 %v3412_v12, %s2942_s23  ;;  %v1635_v34 = vpop.permute.xlu1 %1634 }
 0x2b4   : > { %1655 = vst.msk [vmem:[%s3203_s29 + $0x35] sm:$0x1] %vm1459_vm12, %v1635_v34 }
 0x2b5   : > { %v1950_v8 = vpop.permute.xlu0 %1949  ;;  %1674 = vrot.lane.b32.xlu1 %v3423_v19, %s2936_s7  ;;  %v4114_v19 = vrot.slane %v3362_v40, %v3192_v16  ;;  %s2945_s7 = smov [#allocation3]  }
 0x2b6   : > { %1971 = vst.msk [vmem:[%s3203_s29 + $0x28] sm:$0x1] %vm1459_vm12, %v1950_v8 }
 0x2b7   : > { %2256 = vrot.lane.b32.xlu0 %v2199_v1, %s2944_s28  ;;  %v1639_v25 = vpop.permute.xlu1 %1638 }
 0x2b8   : > { %1657 = vst.msk [vmem:[%s3203_s29 + $0x55] sm:$0x1] %vm1459_vm12, %v1639_v25 }
 0x2b9   : > { %v1954_v54 = vpop.permute.xlu0 %1953  ;;  %1821 = vrot.lane.b32.xlu1 %v1774_v21, %s2939_s18  ;;  %v4116_v21 = vrot.slane %v3374_v28, %v3192_v16 }
 0x2ba   : > { %1973 = vst.msk [vmem:[%s3203_s29 + $0x48] sm:$0x1] %vm1459_vm12, %v1954_v54 }
 0x2bb   : > { %2260 = vrot.lane.b32.xlu0 %v4114_v19, %s2944_s28  ;;  %v1667_v38 = vpop.permute.xlu1 %1666 }
 0x2bc   : > { %1687 = vst.msk [vmem:[%s3203_s29 + $0x36] sm:$0x1] %vm1459_vm12, %v1667_v38 }
 0x2bd   : > { %v1982_v1 = vpop.permute.xlu0 %1981  ;;  %1837 = vrot.lane.b32.xlu1 %v4115_v30, %s2939_s18 }
 0x2be   : > { %2003 = vst.msk [vmem:[%s3203_s29 + $0x29] sm:$0x1] %vm1459_vm12, %v1982_v1 }
 0x2bf   : > { %2272 = vrot.lane.b32.xlu0 %v4116_v21, %s2944_s28  ;;  %v1671_v40 = vpop.permute.xlu1 %1670 }
 0x2c0   : > { %1689 = vst.msk [vmem:[%s3203_s29 + $0x56] sm:$0x1] %vm1459_vm12, %v1671_v40 }
 0x2c1   : > { %v1986_v55 = vpop.permute.xlu0 %1985  ;;  %1959 = vrot.lane.b32.xlu1 %v3446_v37, %s2937_s9  ;;  %s2843_s9 = sshll.u32 %s2945_s7, 4  ;;  %s2844_s9 = int_to_ptr.vmem [resolvable:$false] %s2843_s9 }
 0x2c2   : > { %2005 = vst.msk [vmem:[%s3203_s29 + $0x49] sm:$0x1] %vm1459_vm12, %v1986_v55  ;;  %p2846_p1 = scmp.lt.s32.totalorder %s4056_s11, %s2844_s9 }
 0x2c3   : > { %2276 = vrot.lane.b32.xlu0 %v4117_v58, %s2944_s28  ;;  %v3863_v36 = vpop.permute.xlu1 %1813 }
 0x2c5   : > { %v2014_v28 = vpop.permute.xlu0 %2013  ;;  %1991 = vrot.lane.b32.xlu1 %v3446_v37, %s2938_s10  ;;  %s2845_s10 = scalar_lea.vmem %s2844_s9, 4096 }
 0x2c6   : > { %2035 = vst.msk [vmem:[%s3203_s29 + $0x2a] sm:$0x1] %vm1459_vm12, %v2014_v28  ;;  %p2847_p2 = scmp.lt.s32.totalorder %s2845_s10, %s2839_s15 }
 0x2c7   : > { %2117 = vrot.lane.b32.xlu0 %v3412_v12, %s2943_s26  ;;  %v3871_v41 = vpop.permute.xlu1 %1817  ;;  %v4119_v12 = vrot.slane %v3418_v13, %v3192_v16 }
 0x2c8   : > { %p2848_p3 = por %p2847_p2, %p2846_p1 }
 0x2c9   : > { %v2018_v59 = vpop.permute.xlu0 %2017  ;;  %2023 = vrot.lane.b32.xlu1 %v3446_v37, %s2940_s19 }
 0x2ca   : > { %2037 = vst.msk [vmem:[%s3203_s29 + $0x4a] sm:$0x1] %vm1459_vm12, %v2018_v59  ;;  %p2849_p5 = pnand %p2848_p3, %p2842_p0 }
 0x2cb   : > { %1819 = vrot.lane.b32.xlu0 %v4118_v46, %s2939_s18  ;;  %v3881_v20 = vpop.permute.xlu1 %1829 }
 0x2cd   : > { %v2046_v63 = vpop.permute.xlu0 %2045  ;;  %2055 = vrot.lane.b32.xlu1 %v3446_v37, %s2941_s21 }
 0x2ce   : > { %2067 = vst.msk [vmem:[%s3203_s29 + $0x2b] sm:$0x1] %vm1459_vm12, %v2046_v63 }
 0x2cf   : > { %1835 = vrot.lane.b32.xlu0 %v4119_v12, %s2939_s18  ;;  %v3891_v29 = vpop.permute.xlu1 %1833 }
 0x2d1   : > { %v2050_v11 = vpop.permute.xlu0 %2049  ;;  %2087 = vrot.lane.b32.xlu1 %v3446_v37, %s2942_s23 }
 0x2d2   : > { %2069 = vst.msk [vmem:[%s3203_s29 + $0x4b] sm:$0x1] %vm1459_vm12, %v2050_v11 }
 0x2d3   : > { %2264 = vrot.lane.b32.xlu0 %v2215_v27, %s2944_s28  ;;  %v1952_v3 = vpop.permute.xlu1 %1951 }
 0x2d4   : > { %1972 = vst.msk [vmem:[%s3203_s29 + $0x38] sm:$0x1] %vm1459_vm12, %v1952_v3 }
 0x2d5   : > { %v2078_v13 = vpop.permute.xlu0 %2077  ;;  %2266 = vrot.lane.b32.xlu1 %v2219_v62, %s2944_s28 }
 0x2d6   : > { %2099 = vst.msk [vmem:[%s3203_s29 + $0x2c] sm:$0x1] %vm1459_vm12, %v2078_v13 }
 0x2d7   : > { %2280 = vrot.lane.b32.xlu0 %v2247_v57, %s2944_s28  ;;  %v1956_v17 = vpop.permute.xlu1 %1955 }
 0x2d8   : > { %1974 = vst.msk [vmem:[%s3203_s29 + $0x58] sm:$0x1] %vm1459_vm12, %v1956_v17 }
 0x2d9   : > { %v2082_v27 = vpop.permute.xlu0 %2081  ;;  %2282 = vrot.lane.b32.xlu1 %v4120_v42, %s2944_s28 }
 0x2da   : > { %2101 = vst.msk [vmem:[%s3203_s29 + $0x4c] sm:$0x1] %vm1459_vm12, %v2082_v27 }
 0x2db   : > { %2401 = vrot.lane.b32.xlu0 %v3452_v35, %s2932_s30  ;;  %v1984_v33 = vpop.permute.xlu1 %1983 }
 0x2dc   : > { %2004 = vst.msk [vmem:[%s3203_s29 + $0x39] sm:$0x1] %vm1459_vm12, %v1984_v33 }
 0x2dd   : > { %v2253_v16 = vpop.permute.xlu0 %2252  ;;  %2119 = vrot.lane.b32.xlu1 %v3446_v37, %s2943_s26 }
 0x2de   : > { %v2284_v39 = vsel %vm281_vm2, %v2253_v16, %v3703_v51 }
 0x2df   : > { %2300 = vst.msk [vmem:[%s3203_s29 + $0xe] sm:$0x1] %vm1459_vm12, %v2284_v39  ;;  %v1988_v57 = vpop.permute.xlu1 %1987 }
 0x2e0   : > { %2006 = vst.msk [vmem:[%s3203_s29 + $0x59] sm:$0x1] %vm1459_vm12, %v1988_v57 }
 0x2e1   : > { %v2269_v35 = vpop.permute.xlu0 %2268  ;;  %2403 = vrot.lane.b32.xlu1 %v3458_v15, %s2932_s30 }
 0x2e2   : > { %v2288_v61 = vsel %vm281_vm2, %v2269_v35, %v3711_v4 }
 0x2e3   : > { %2304 = vst.msk [vmem:[%s3203_s29 + $0x4e] sm:$0x1] %vm1459_vm12, %v2288_v61  ;;  %v2016_v37 = vpop.permute.xlu1 %2015 }
 0x2e4   : > { %2036 = vst.msk [vmem:[%s3203_s29 + $0x3a] sm:$0x1] %vm1459_vm12, %v2016_v37 }
 0x2e5   : > { %v2110_v62 = vpop.permute.xlu0 %2109 }
 0x2e6   : > { %2131 = vst.msk [vmem:[%s3203_s29 + $0x2d] sm:$0x1] %vm1459_vm12, %v2110_v62 }
 0x2e7   : > { %v2020_v31 = vpop.permute.xlu1 %2019 }
 0x2e8   : > { %2038 = vst.msk [vmem:[%s3203_s29 + $0x5a] sm:$0x1] %vm1459_vm12, %v2020_v31 }
 0x2e9   : > { %v2114_v15 = vpop.permute.xlu0 %2113 }
 0x2ea   : > { %2133 = vst.msk [vmem:[%s3203_s29 + $0x4d] sm:$0x1] %vm1459_vm12, %v2114_v15 }
 0x2eb   : > { %v2048_v47 = vpop.permute.xlu1 %2047 }
 0x2ec   : > { %2068 = vst.msk [vmem:[%s3203_s29 + $0x3b] sm:$0x1] %vm1459_vm12, %v2048_v47 }
 0x2ed   : > { %v1513_v51 = vpop.permute.xlu0 %1512 }
 0x2ee   : > { %1530 = vst.msk [vmem:[%s3203_s29 + $0x61] sm:$0x1] %vm1459_vm12, %v1513_v51 }
 0x2ef   : > { %v2052_v60 = vpop.permute.xlu1 %2051 }
 0x2f0   : > { %2070 = vst.msk [vmem:[%s3203_s29 + $0x5b] sm:$0x1] %vm1459_vm12, %v2052_v60 }
 0x2f1   : > { %v1545_v4 = vpop.permute.xlu0 %1544 }
 0x2f2   : > { %1562 = vst.msk [vmem:[%s3203_s29 + $0x62] sm:$0x1] %vm1459_vm12, %v1545_v4 }
 0x2f3   : > { %v2080_v2 = vpop.permute.xlu1 %2079 }
 0x2f4   : > { %2100 = vst.msk [vmem:[%s3203_s29 + $0x3c] sm:$0x1] %vm1459_vm12, %v2080_v2 }
 0x2f5   : > { %v1577_v5 = vpop.permute.xlu0 %1576 }
 0x2f6   : > { %1594 = vst.msk [vmem:[%s3203_s29 + $0x63] sm:$0x1] %vm1459_vm12, %v1577_v5 }
 0x2f7   : > { %v2084_v0 = vpop.permute.xlu1 %2083 }
 0x2f8   : > { %2102 = vst.msk [vmem:[%s3203_s29 + $0x5c] sm:$0x1] %vm1459_vm12, %v2084_v0 }
 0x2f9   : > { %v1609_v49 = vpop.permute.xlu0 %1608 }
 0x2fa   : > { %1626 = vst.msk [vmem:[%s3203_s29 + $0x64] sm:$0x1] %vm1459_vm12, %v1609_v49 }
 0x2fb   : > { %v2259_v6 = vpop.permute.xlu1 %2258 }
 0x2fd   : > { %v1641_v50 = vpop.permute.xlu0 %1640 }
 0x2fe   : > { %1658 = vst.msk [vmem:[%s3203_s29 + $0x65] sm:$0x1] %vm1459_vm12, %v1641_v50 }
 0x2ff   : > { %v2263_v44 = vpop.permute.xlu1 %2262 }
 0x301   : > { %v1673_v22 = vpop.permute.xlu0 %1672 }
 0x302   : > { %1690 = vst.msk [vmem:[%s3203_s29 + $0x66] sm:$0x1] %vm1459_vm12, %v1673_v22 }
 0x303   : > { %v2275_v43 = vpop.permute.xlu1 %2274 }
 0x305   : > { %v1812_v52 = vpop.permute.xlu0 %1811 }
 0x306   : > { %v1841_v14 = vsel %vm1839_vm13, %v1812_v52, %v3863_v36 }
 0x307   : > { %1857 = vst.msk [vmem:[%s3203_s29 + $0x17] sm:$0x1] %vm1459_vm12, %v1841_v14  ;;  %v2279_v26 = vpop.permute.xlu1 %2278 }
 0x309   : > { %v1816_v24 = vpop.permute.xlu0 %1815 }
 0x30a   : > { %v1842_v45 = vsel %vm1839_vm13, %v1816_v24, %v3871_v41 }
 0x30b   : > { %1858 = vst.msk [vmem:[%s3203_s29 + $0x27] sm:$0x1] %vm1459_vm12, %v1842_v45  ;;  %v2112_v48 = vpop.permute.xlu1 %2111 }
 0x30c   : > { %2132 = vst.msk [vmem:[%s3203_s29 + $0x3d] sm:$0x1] %vm1459_vm12, %v2112_v48 }
 0x30d   : > { %v1828_v18 = vpop.permute.xlu0 %1827 }
 0x30e   : > { %v1845_v10 = vsel %vm1839_vm13, %v1828_v18, %v3881_v20 }
 0x30f   : > { %1861 = vst.msk [vmem:[%s3203_s29 + $0x57] sm:$0x1] %vm1459_vm12, %v1845_v10  ;;  %v2116_v53 = vpop.permute.xlu1 %2115 }
 0x310   : > { %2134 = vst.msk [vmem:[%s3203_s29 + $0x5d] sm:$0x1] %vm1459_vm12, %v2116_v53 }
 0x311   : > { %v1832_v56 = vpop.permute.xlu0 %1831 }
 0x312   : > { %v1846_v9 = vsel %vm1839_vm13, %v1832_v56, %v3891_v29 }
 0x313   : > { %1862 = vst.msk [vmem:[%s3203_s29 + $0x67] sm:$0x1] %vm1459_vm12, %v1846_v9  ;;  %v1515_v32 = vpop.permute.xlu1 %1514 }
 0x314   : > { %1531 = vst.msk [vmem:[%s3203_s29 + $0x71] sm:$0x1] %vm1459_vm12, %v1515_v32 }
 0x315   : > { %v1958_v23 = vpop.permute.xlu0 %1957 }
 0x316   : > { %1975 = vst.msk [vmem:[%s3203_s29 + $0x68] sm:$0x1] %vm1459_vm12, %v1958_v23 }
 0x317   : > { %v1547_v7 = vpop.permute.xlu1 %1546 }
 0x318   : > { %1563 = vst.msk [vmem:[%s3203_s29 + $0x72] sm:$0x1] %vm1459_vm12, %v1547_v7 }
 0x319   : > { %v1990_v34 = vpop.permute.xlu0 %1989 }
 0x31a   : > { %2007 = vst.msk [vmem:[%s3203_s29 + $0x69] sm:$0x1] %vm1459_vm12, %v1990_v34 }
 0x31b   : > { %v1579_v8 = vpop.permute.xlu1 %1578 }
 0x31c   : > { %1595 = vst.msk [vmem:[%s3203_s29 + $0x73] sm:$0x1] %vm1459_vm12, %v1579_v8 }
 0x31d   : > { %v2022_v25 = vpop.permute.xlu0 %2021 }
 0x31e   : > { %2039 = vst.msk [vmem:[%s3203_s29 + $0x6a] sm:$0x1] %vm1459_vm12, %v2022_v25 }
 0x31f   : > { %v1611_v54 = vpop.permute.xlu1 %1610 }
 0x320   : > { %1627 = vst.msk [vmem:[%s3203_s29 + $0x74] sm:$0x1] %vm1459_vm12, %v1611_v54 }
 0x321   : > { %v2054_v19 = vpop.permute.xlu0 %2053 }
 0x322   : > { %2071 = vst.msk [vmem:[%s3203_s29 + $0x6b] sm:$0x1] %vm1459_vm12, %v2054_v19 }
 0x323   : > { %v1643_v38 = vpop.permute.xlu1 %1642 }
 0x324   : > { %1659 = vst.msk [vmem:[%s3203_s29 + $0x75] sm:$0x1] %vm1459_vm12, %v1643_v38 }
 0x325   : > { %v2086_v1 = vpop.permute.xlu0 %2085 }
 0x326   : > { %2103 = vst.msk [vmem:[%s3203_s29 + $0x6c] sm:$0x1] %vm1459_vm12, %v2086_v1 }
 0x327   : > { %v1675_v30 = vpop.permute.xlu1 %1674 }
 0x328   : > { %1691 = vst.msk [vmem:[%s3203_s29 + $0x76] sm:$0x1] %vm1459_vm12, %v1675_v30 }
 0x329   : > { %v2257_v21 = vpop.permute.xlu0 %2256 }
 0x32a   : > { %v2285_v40 = vsel %vm281_vm2, %v2257_v21, %v2259_v6 }
 0x32b   : > { %2301 = vst.msk [vmem:[%s3203_s29 + $0x1e] sm:$0x1] %vm1459_vm12, %v2285_v40  ;;  %v1822_v55 = vpop.permute.xlu1 %1821 }
 0x32d   : > { %v2261_v58 = vpop.permute.xlu0 %2260 }
 0x32e   : > { %v2286_v36 = vsel %vm281_vm2, %v2261_v58, %v2263_v44 }
 0x32f   : > { %2302 = vst.msk [vmem:[%s3203_s29 + $0x2e] sm:$0x1] %vm1459_vm12, %v2286_v36  ;;  %v1838_v28 = vpop.permute.xlu1 %1837 }
 0x331   : > { %v2273_v41 = vpop.permute.xlu0 %2272 }
 0x332   : > { %v2289_v59 = vsel %vm281_vm2, %v2273_v41, %v2275_v43 }
 0x333   : > { %2305 = vst.msk [vmem:[%s3203_s29 + $0x5e] sm:$0x1] %vm1459_vm12, %v2289_v59  ;;  %v1960_v46 = vpop.permute.xlu1 %1959 }
 0x334   : > { %1976 = vst.msk [vmem:[%s3203_s29 + $0x78] sm:$0x1] %vm1459_vm12, %v1960_v46 }
 0x335   : > { %v2277_v20 = vpop.permute.xlu0 %2276 }
 0x336   : > { %v2290_v63 = vsel %vm281_vm2, %v2277_v20, %v2279_v26 }
 0x337   : > { %2306 = vst.msk [vmem:[%s3203_s29 + $0x6e] sm:$0x1] %vm1459_vm12, %v2290_v63  ;;  %v1992_v12 = vpop.permute.xlu1 %1991 }
 0x338   : > { %2008 = vst.msk [vmem:[%s3203_s29 + $0x79] sm:$0x1] %vm1459_vm12, %v1992_v12 }
 0x339   : > { %v2118_v29 = vpop.permute.xlu0 %2117 }
 0x33a   : > { %2135 = vst.msk [vmem:[%s3203_s29 + $0x6d] sm:$0x1] %vm1459_vm12, %v2118_v29 }
 0x33b   : > { %v2024_v11 = vpop.permute.xlu1 %2023 }
 0x33c   : > { %2040 = vst.msk [vmem:[%s3203_s29 + $0x7a] sm:$0x1] %vm1459_vm12, %v2024_v11 }
 0x33d   : > { %v1820_v3 = vpop.permute.xlu0 %1819 }
 0x33e   : > { %v1843_v13 = vsel %vm1839_vm13, %v1820_v3, %v1822_v55 }
 0x33f   : > { %1859 = vst.msk [vmem:[%s3203_s29 + $0x37] sm:$0x1] %vm1459_vm12, %v1843_v13  ;;  %v2056_v17 = vpop.permute.xlu1 %2055 }
 0x340   : > { %2072 = vst.msk [vmem:[%s3203_s29 + $0x7b] sm:$0x1] %vm1459_vm12, %v2056_v17 }
 0x341   : > { %v1836_v27 = vpop.permute.xlu0 %1835 }
 0x342   : > { %v1847_v42 = vsel %vm1839_vm13, %v1836_v27, %v1838_v28 }
 0x343   : > { %1863 = vst.msk [vmem:[%s3203_s29 + $0x77] sm:$0x1] %vm1459_vm12, %v1847_v42  ;;  %v2088_v33 = vpop.permute.xlu1 %2087 }
 0x344   : > { %2104 = vst.msk [vmem:[%s3203_s29 + $0x7c] sm:$0x1] %vm1459_vm12, %v2088_v33 }
 0x345   : > { %v2265_v16 = vpop.permute.xlu0 %2264 }
 0x347   : > { %v2267_v39 = vpop.permute.xlu1 %2266 }
 0x348   : > { %v2287_v57 = vsel %vm281_vm2, %v2265_v16, %v2267_v39 }
 0x349   : > { %v2281_v35 = vpop.permute.xlu0 %2280  ;;  %2303 = vst.msk [vmem:[%s3203_s29 + $0x3e] sm:$0x1] %vm1459_vm12, %v2287_v57 }
 0x34b   : > { %v2283_v61 = vpop.permute.xlu1 %2282 }
 0x34c   : > { %v2291_v37 = vsel %vm281_vm2, %v2281_v35, %v2283_v61 }
 0x34d   : > { %v2402_v62 = vpop.permute.xlu0 %2401  ;;  %2307 = vst.msk [vmem:[%s3203_s29 + $0x7e] sm:$0x1] %vm1459_vm12, %v2291_v37 }
 0x34e   : > { %2419 = vst.msk [vmem:[%s3203_s29 + $0x6f] sm:$0x1] %vm1459_vm12, %v2402_v62 }
 0x34f   : > { %v2120_v31 = vpop.permute.xlu1 %2119 }
 0x350   : > { %2136 = vst.msk [vmem:[%s3203_s29 + $0x7d] sm:$0x1] %vm1459_vm12, %v2120_v31 }
 0x353   : > { %v2404_v15 = vpop.permute.xlu1 %2403 }
 0x354   : > { %2420 = vst.msk [vmem:[%s3203_s29 + $0x7f] sm:$0x1] %vm1459_vm12, %v2404_v15 }
 0x355   : > { %2852 = shalt.err (!%p2849_p5)
}
 0x356   : > { %s2853_s27 = scalar_lea.hbm %s4054_s5, 2048  ;;  %s2857_s19 = scalar_lea.hbm %s4111_s3, 4096 }
 0x357   : > { %p2854_p6 = scmp.ne.s32.totalorder %s4054_s5, %s2853_s27  ;;  %p2858_p10 = scmp.lt.u32.totalorder %s4054_s5, %s4111_s3 }
 0x358   : > { %p2859_p11 = scmp.lt.u32.totalorder %s2857_s19, %s2853_s27  ;;  %p2861_p13 = scmp.lt.u32.totalorder %s2853_s27, %s4054_s5 }
 0x359   : > { %p2855_p7 = pnand %p2854_p6, %p3008_p4 }
 0x35a   : > { %p2860_p12 = por %p2859_p11, %p2858_p10 }
 0x35b   : > { %p2856_p9 = pneg %p2855_p7 }
 0x35c   : > { %p2862_p0 = por %p2861_p13, %p2860_p12 }
 0x35e   : > { %p2863_p1 = pnand %p2862_p0, %p2856_p9 }
 0x360   : > { %2866 = shalt.err (!%p2863_p1)
}
 0x361   : > { %s2946_s26 = smov 128   ;;  %s2947_s28 = smov 8  }
 0x362   : > { %2746 = dma.vmem_to_hbm [thread:$0]  (%p3008_p4), %s4056_s11, 2048, %s4054_s5, %s4062_s6, %s2946_s26, %s2946_s26, %s2947_s28  }
 0x363 PF: > { %p2752_p2 = scmp.ge.s32.totalorder %s2917_s17, 2  ;;  %s2453_s8 = sand.u32 1, %s2897_s12  }
 0x364   : > { %s2454_s30 = scalar_lea.sflag [#allocation4], %s2453_s8 }
 0x365   : > { %p2749_p3 = pnand %p2752_p2, %p3015_p8 }
 0x367   : > { %2892 = dma.done.wait (!%p2749_p3), %s2454_s30, 2048  }
 0x368   : > { %2894 = vsyncadd (!%p2749_p3), %s2454_s30, 4294965248  ;;  %s16_s17 = sadd.s32 1, %s2917_s17   ;;  %s4121_s12 = smov %s2901_s13 }
 0x369   : > { %p13_p5 = scmp.ge.s32.totalorder %s16_s17, 4   ;;  %s4122_s13 = smov %s2905_s14 }
 0x36a   : > { %s4123_s14 = smov %s3021_s25  ;;  %s4124_s15 = smov %s2913_s16 }
 0x36b   : > { %s4125_s16 = smov %s4127_s20  ;;  %15 = sbr.rel (!%p13_p5) target bundleno = 4 (0x4), region = 89 }
 0x372   :  { %2459 = vsyncpa [#allocation4], 1 }
 0x373   :  { %2461 = vsyncpa [#allocation4 + $0x1], 1 }

</bundles_post_ra>
